<compile_context>
chip_gen: v7x
topology: tpu7x:2x2x1
jax: 0.10.0
libtpu: 0.0.40
codegen_flags: <defaults>
</compile_context>

<pallas_src>
import functools

import jax
import jax.numpy as jnp
from jax.experimental import pallas as pl
from jax.experimental.pallas import tpu as pltpu

EPS = 1e-5          # nn.InstanceNorm2d default eps (affine=False, biased variance)
LEAKY_SLOPE = 0.2   # nn.LeakyReLU(0.2)


def _conv_block_kernel(w_ref, b_ref, p_ref, o_ref, *, do_norm, neg_slope):
    """One PatchGAN layer for one image: conv-as-matmul + bias (+ InstanceNorm) (+ LeakyReLU).

    w_ref : (Cout, K)  VMEM, K = Cin*4*4
    b_ref : (Cout, 1)  VMEM
    p_ref : (K, N)     VMEM, im2col patches, N = H_out*W_out (lane-dense last axis)
    o_ref : (Cout, N)  VMEM
    """
    acc = jnp.dot(w_ref[...], p_ref[...], preferred_element_type=jnp.float32)  # MXU
    acc = acc + b_ref[...]                              # (Cout,1) broadcasts over lanes
    if do_norm:
        # fused one-pass instance norm: var = E[x^2] - mean^2 (single walk over acc)
        mean = jnp.mean(acc, axis=-1, keepdims=True)
        msq = jnp.mean(acc * acc, axis=-1, keepdims=True)
        var = jnp.maximum(msq - mean * mean, 0.0)
        acc = (acc - mean) * jax.lax.rsqrt(var + EPS)
    if neg_slope is not None:
        acc = jnp.where(acc >= 0.0, acc, neg_slope * acc)   # LeakyReLU
    o_ref[...] = acc.astype(o_ref.dtype)


def _im2col(x, k, stride, pad):
    """[B, C, H, W] -> ([B, C*k*k, Ho*Wo], Ho, Wo).  Pure layout plumbing (no compute)."""
    B, C, H, W = x.shape
    Ho = (H + 2 * pad - k) // stride + 1
    Wo = (W + 2 * pad - k) // stride + 1
    xp = jnp.pad(x, ((0, 0), (0, 0), (pad, pad), (pad, pad)))
    cols = []
    for kh in range(k):
        for kw in range(k):
            cols.append(xp[:, :, kh::stride, kw::stride][:, :, :Ho, :Wo])
    patches = jnp.stack(cols, axis=2)                    # [B, C, k*k, Ho, Wo]
    return patches.reshape(B, C * k * k, Ho * Wo), Ho, Wo


def conv_block(x, w, b, *, stride, do_norm, neg_slope):
    """Conv2d(k=4, p=1, stride=stride) [+ InstanceNorm2d] [+ LeakyReLU], NCHW layout."""
    B, C_in, H, W = x.shape
    C_out, _, k, _ = w.shape
    patches, Ho, Wo = _im2col(x, k=k, stride=stride, pad=1)
    K = C_in * k * k
    N = Ho * Wo
    wf = w.reshape(C_out, K).astype(jnp.float32)
    bf = b.reshape(C_out, 1).astype(jnp.float32)

    kernel = functools.partial(_conv_block_kernel, do_norm=do_norm, neg_slope=neg_slope)
    out = pl.pallas_call(
        kernel,
        out_shape=jax.ShapeDtypeStruct((B, C_out, N), jnp.float32),
        grid_spec=pltpu.PrefetchScalarGridSpec(
            num_scalar_prefetch=0,
            grid=(B,),
            in_specs=[
                pl.BlockSpec((C_out, K), lambda bb: (0, 0)),        # weights stay resident
                pl.BlockSpec((C_out, 1), lambda bb: (0, 0)),        # bias stays resident
                pl.BlockSpec((None, K, N), lambda bb: (bb, 0, 0)),  # one image's patches
            ],
            out_specs=pl.BlockSpec((None, C_out, N), lambda bb: (bb, 0, 0)),
        ),
        compiler_params=pltpu.CompilerParams(dimension_semantics=("parallel",)),
    )(wf, bf, patches)
    return out.reshape(B, C_out, Ho, Wo)


def patchgan_discriminator(x, params):
    """params: list of 5 (w, b) pairs matching the PyTorch module's conv stack in order."""
    (w1, b1), (w2, b2), (w3, b3), (w4, b4), (w5, b5) = params
    h = conv_block(x, w1, b1, stride=2, do_norm=False, neg_slope=LEAKY_SLOPE)   # first conv
    h = conv_block(h, w2, b2, stride=2, do_norm=True, neg_slope=LEAKY_SLOPE)    # block 1
    h = conv_block(h, w3, b3, stride=2, do_norm=True, neg_slope=LEAKY_SLOPE)    # block 2
    h = conv_block(h, w4, b4, stride=1, do_norm=True, neg_slope=LEAKY_SLOPE)    # block 3 (last feature)
    return conv_block(h, w5, b5, stride=1, do_norm=False, neg_slope=None)       # final 1-channel conv


def _reference(x, params):
    """Pure-JAX reference mirroring the PyTorch module exactly."""
    def conv(inp, w, b, stride):
        y = jax.lax.conv_general_dilated(
            inp, w, (stride, stride), ((1, 1), (1, 1)),
            dimension_numbers=("NCHW", "OIHW", "NCHW"),
            precision=jax.lax.Precision.HIGHEST)
        return y + b[None, :, None, None]

    def inorm(y):
        m = y.mean(axis=(2, 3), keepdims=True)
        v = ((y - m) ** 2).mean(axis=(2, 3), keepdims=True)
        return (y - m) / jnp.sqrt(v + EPS)

    def lrelu(y):
        return jnp.where(y >= 0.0, y, LEAKY_SLOPE * y)

    (w1, b1), (w2, b2), (w3, b3), (w4, b4), (w5, b5) = params
    h = lrelu(conv(x, w1, b1, 2))
    h = lrelu(inorm(conv(h, w2, b2, 2)))
    h = lrelu(inorm(conv(h, w3, b3, 2)))
    h = lrelu(inorm(conv(h, w4, b4, 1)))
    return conv(h, w5, b5, 1)


if __name__ == "__main__":
    # Small stand-in shapes: in_channels=3, features=[8,16,32,64] (module default is
    # [64,128,256,512]), 32x32 input -> 2x2 patch map output.
    B, C_in, H, W = 2, 3, 32, 32
    features = [8, 16, 32, 64]

    key = jax.random.PRNGKey(0)
    kx, *pkeys = jax.random.split(key, 1 + 10)
    x = jax.random.normal(kx, (B, C_in, H, W), jnp.float32)

    cins = [C_in] + features           # (3,8) (8,16) (16,32) (32,64) (64,1)
    couts = features + [1]
    params = []
    for i, (ci, co) in enumerate(zip(cins, couts)):
        fan_in = ci * 4 * 4
        w = jax.random.normal(pkeys[2 * i], (co, ci, 4, 4), jnp.float32) / jnp.sqrt(fan_in)
        b = jax.random.normal(pkeys[2 * i + 1], (co,), jnp.float32) * 0.1
        params.append((w, b))

    out = jax.block_until_ready(jax.jit(patchgan_discriminator)(x, params))

    expected = _reference(x, params)
    assert out.shape == expected.shape and out.dtype == expected.dtype, (out.shape, out.dtype)
    # Tolerance budgets MXU f32 contraction precision across 5 chained conv+InstanceNorm
    # layers; structural errors (wrong stride/pad/norm) would be O(1), far above this.
    assert jnp.allclose(out, expected, atol=3e-2, rtol=3e-2), \
        float(jnp.max(jnp.abs(out - expected)))
    print("KERNEL_OK")
</pallas_src>

<mosaic_0001>
module attributes {stable_mosaic.version = 11 : i64} {
  func.func @_conv_block_kernel(%arg0: i32, %arg1: memref<8x48xf32, #tpu.memory_space<vmem>>, %arg2: memref<8x1xf32, #tpu.memory_space<vmem>>, %arg3: memref<1x48x256xf32, #tpu.memory_space<vmem>>, %arg4: memref<1x8x256xf32, #tpu.memory_space<vmem>>) attributes {dimension_semantics = [#tpu.dimension_semantics<parallel>], iteration_bounds = array<i64: 2>, scalar_prefetch = 0 : i64, scratch_operands = 0 : i64, tpu.core_type = #tpu.core_type<tc>, window_params = [{pipeline_mode = #tpu.pipeline_mode<synchronous>, transform_indices = @transform_0, window_bounds = array<i64: 8, 48>}, {pipeline_mode = #tpu.pipeline_mode<synchronous>, transform_indices = @transform_1, window_bounds = array<i64: 8, 1>}, {transform_indices = @transform_2, window_bounds = array<i64: 1, 48, 256>}, {transform_indices = @transform_3, window_bounds = array<i64: 1, 8, 256>}]} {
    %c0 = arith.constant 0 : index
    %c0_0 = arith.constant 0 : index
    %0 = vector.load %arg1[%c0, %c0_0] : memref<8x48xf32, #tpu.memory_space<vmem>>, vector<8x48xf32>
    %c0_1 = arith.constant 0 : index
    %c0_2 = arith.constant 0 : index
    %c0_3 = arith.constant 0 : index
    %1 = vector.load %arg3[%c0_1, %c0_2, %c0_3] : memref<1x48x256xf32, #tpu.memory_space<vmem>>, vector<1x48x256xf32>
    %2 = vector.shape_cast %1 : vector<1x48x256xf32> to vector<48x256xf32>
    %cst = arith.constant dense<0.000000e+00> : vector<8x256xf32>
    %3 = tpu.matmul %0, %2, %cst {dimension_numbers = #tpu.dot_dimension_numbers<[1], [0], [0], [1], [0, 0, 1, 1], [], []>} : vector<8x48xf32>, vector<48x256xf32>, vector<8x256xf32> -> vector<8x256xf32>
    %c0_4 = arith.constant 0 : index
    %c0_5 = arith.constant 0 : index
    %4 = vector.load %arg2[%c0_4, %c0_5] : memref<8x1xf32, #tpu.memory_space<vmem>>, vector<8x1xf32>
    %5 = vector.broadcast %4 : vector<8x1xf32> to vector<8x256xf32>
    %6 = arith.addf %3, %5 : vector<8x256xf32>
    %cst_6 = arith.constant 0.000000e+00 : f32
    %7 = vector.broadcast %cst_6 : f32 to vector<8x256xf32>
    %8 = arith.cmpf oge, %6, %7 : vector<8x256xf32>
    %cst_7 = arith.constant 2.000000e-01 : f32
    %9 = vector.broadcast %cst_7 : f32 to vector<8x256xf32>
    %10 = arith.mulf %9, %6 : vector<8x256xf32>
    %11 = arith.select %8, %6, %10 : vector<8x256xi1>, vector<8x256xf32>
    %c0_8 = arith.constant 0 : index
    %c0_9 = arith.constant 0 : index
    %c0_10 = arith.constant 0 : index
    %12 = vector.load %arg4[%c0_8, %c0_9, %c0_10] : memref<1x8x256xf32, #tpu.memory_space<vmem>>, vector<1x8x256xf32>
    %13 = vector.shape_cast %12 : vector<1x8x256xf32> to vector<8x256xf32>
    %14 = vector.shape_cast %11 : vector<8x256xf32> to vector<1x8x256xf32>
    tpu.vector_store %arg4[%c0_8, %c0_9, %c0_10], %14 {strides = array<i32>} : memref<1x8x256xf32, #tpu.memory_space<vmem>>, vector<1x8x256xf32>,
    return
  }
  func.func @transform_0(%arg0: i32) -> (i32, i32) {
    %c0_i32 = arith.constant 0 : i32
    %c0_i32_0 = arith.constant 0 : i32
    %c0_i32_1 = arith.constant 0 : i32
    return %c0_i32, %c0_i32_0 : i32, i32
  }
  func.func @transform_1(%arg0: i32) -> (i32, i32) {
    %c0_i32 = arith.constant 0 : i32
    %c0_i32_0 = arith.constant 0 : i32
    %c0_i32_1 = arith.constant 0 : i32
    return %c0_i32, %c0_i32_0 : i32, i32
  }
  func.func @transform_2(%arg0: i32) -> (i32, i32, i32) {
    %c0_i32 = arith.constant 0 : i32
    %c0_i32_0 = arith.constant 0 : i32
    %c0_i32_1 = arith.constant 0 : i32
    return %arg0, %c0_i32, %c0_i32_0 : i32, i32, i32
  }
  func.func @transform_3(%arg0: i32) -> (i32, i32, i32) {
    %c0_i32 = arith.constant 0 : i32
    %c0_i32_0 = arith.constant 0 : i32
    %c0_i32_1 = arith.constant 0 : i32
    return %arg0, %c0_i32, %c0_i32_0 : i32, i32, i32
  }
}

module attributes {stable_mosaic.version = 11 : i64} {
  func.func @_conv_block_kernel(%arg0: i32, %arg1: memref<16x128xf32, #tpu.memory_space<vmem>>, %arg2: memref<16x1xf32, #tpu.memory_space<vmem>>, %arg3: memref<1x128x64xf32, #tpu.memory_space<vmem>>, %arg4: memref<1x16x64xf32, #tpu.memory_space<vmem>>) attributes {dimension_semantics = [#tpu.dimension_semantics<parallel>], iteration_bounds = array<i64: 2>, scalar_prefetch = 0 : i64, scratch_operands = 0 : i64, tpu.core_type = #tpu.core_type<tc>, window_params = [{pipeline_mode = #tpu.pipeline_mode<synchronous>, transform_indices = @transform_0, window_bounds = array<i64: 16, 128>}, {pipeline_mode = #tpu.pipeline_mode<synchronous>, transform_indices = @transform_1, window_bounds = array<i64: 16, 1>}, {transform_indices = @transform_2, window_bounds = array<i64: 1, 128, 64>}, {transform_indices = @transform_3, window_bounds = array<i64: 1, 16, 64>}]} {
    %c0 = arith.constant 0 : index
    %c0_0 = arith.constant 0 : index
    %0 = vector.load %arg1[%c0, %c0_0] : memref<16x128xf32, #tpu.memory_space<vmem>>, vector<16x128xf32>
    %c0_1 = arith.constant 0 : index
    %c0_2 = arith.constant 0 : index
    %c0_3 = arith.constant 0 : index
    %1 = vector.load %arg3[%c0_1, %c0_2, %c0_3] : memref<1x128x64xf32, #tpu.memory_space<vmem>>, vector<1x128x64xf32>
    %2 = vector.shape_cast %1 : vector<1x128x64xf32> to vector<128x64xf32>
    %cst = arith.constant dense<0.000000e+00> : vector<16x64xf32>
    %3 = tpu.matmul %0, %2, %cst {dimension_numbers = #tpu.dot_dimension_numbers<[1], [0], [0], [1], [0, 0, 1, 1], [], []>} : vector<16x128xf32>, vector<128x64xf32>, vector<16x64xf32> -> vector<16x64xf32>
    %c0_4 = arith.constant 0 : index
    %c0_5 = arith.constant 0 : index
    %4 = vector.load %arg2[%c0_4, %c0_5] : memref<16x1xf32, #tpu.memory_space<vmem>>, vector<16x1xf32>
    %5 = vector.broadcast %4 : vector<16x1xf32> to vector<16x64xf32>
    %6 = arith.addf %3, %5 : vector<16x64xf32>
    %cst_6 = arith.constant dense<0.000000e+00> : vector<16xf32>
    %7 = vector.multi_reduction <add>, %6, %cst_6 [1] : vector<16x64xf32> to vector<16xf32>
    %8 = vector.shape_cast %7 : vector<16xf32> to vector<16x1xf32>
    %cst_7 = arith.constant 6.400000e+01 : f32
    %9 = vector.broadcast %cst_7 : f32 to vector<16x1xf32>
    %10 = arith.divf %8, %9 : vector<16x1xf32>
    %11 = arith.mulf %6, %6 : vector<16x64xf32>
    %cst_8 = arith.constant dense<0.000000e+00> : vector<16xf32>
    %12 = vector.multi_reduction <add>, %11, %cst_8 [1] : vector<16x64xf32> to vector<16xf32>
    %13 = vector.shape_cast %12 : vector<16xf32> to vector<16x1xf32>
    %cst_9 = arith.constant 6.400000e+01 : f32
    %14 = vector.broadcast %cst_9 : f32 to vector<16x1xf32>
    %15 = arith.divf %13, %14 : vector<16x1xf32>
    %16 = arith.mulf %10, %10 : vector<16x1xf32>
    %17 = arith.subf %15, %16 : vector<16x1xf32>
    %cst_10 = arith.constant 0.000000e+00 : f32
    %18 = vector.broadcast %cst_10 : f32 to vector<16x1xf32>
    %19 = arith.maximumf %17, %18 : vector<16x1xf32>
    %20 = vector.broadcast %10 : vector<16x1xf32> to vector<16x64xf32>
    %21 = arith.subf %6, %20 : vector<16x64xf32>
    %cst_11 = arith.constant 9.99999974E-6 : f32
    %22 = vector.broadcast %cst_11 : f32 to vector<16x1xf32>
    %23 = arith.addf %19, %22 : vector<16x1xf32>
    %24 = math.rsqrt %23 : vector<16x1xf32>
    %25 = vector.broadcast %24 : vector<16x1xf32> to vector<16x64xf32>
    %26 = arith.mulf %21, %25 : vector<16x64xf32>
    %cst_12 = arith.constant 0.000000e+00 : f32
    %27 = vector.broadcast %cst_12 : f32 to vector<16x64xf32>
    %28 = arith.cmpf oge, %26, %27 : vector<16x64xf32>
    %cst_13 = arith.constant 2.000000e-01 : f32
    %29 = vector.broadcast %cst_13 : f32 to vector<16x64xf32>
    %30 = arith.mulf %29, %26 : vector<16x64xf32>
    %31 = arith.select %28, %26, %30 : vector<16x64xi1>, vector<16x64xf32>
    %c0_14 = arith.constant 0 : index
    %c0_15 = arith.constant 0 : index
    %c0_16 = arith.constant 0 : index
    %32 = vector.load %arg4[%c0_14, %c0_15, %c0_16] : memref<1x16x64xf32, #tpu.memory_space<vmem>>, vector<1x16x64xf32>
    %33 = vector.shape_cast %32 : vector<1x16x64xf32> to vector<16x64xf32>
    %34 = vector.shape_cast %31 : vector<16x64xf32> to vector<1x16x64xf32>
    tpu.vector_store %arg4[%c0_14, %c0_15, %c0_16], %34 {strides = array<i32>} : memref<1x16x64xf32, #tpu.memory_space<vmem>>, vector<1x16x64xf32>,
    return
  }
  func.func @transform_0(%arg0: i32) -> (i32, i32) {
    %c0_i32 = arith.constant 0 : i32
    %c0_i32_0 = arith.constant 0 : i32
    %c0_i32_1 = arith.constant 0 : i32
    return %c0_i32, %c0_i32_0 : i32, i32
  }
  func.func @transform_1(%arg0: i32) -> (i32, i32) {
    %c0_i32 = arith.constant 0 : i32
    %c0_i32_0 = arith.constant 0 : i32
    %c0_i32_1 = arith.constant 0 : i32
    return %c0_i32, %c0_i32_0 : i32, i32
  }
  func.func @transform_2(%arg0: i32) -> (i32, i32, i32) {
    %c0_i32 = arith.constant 0 : i32
    %c0_i32_0 = arith.constant 0 : i32
    %c0_i32_1 = arith.constant 0 : i32
    return %arg0, %c0_i32, %c0_i32_0 : i32, i32, i32
  }
  func.func @transform_3(%arg0: i32) -> (i32, i32, i32) {
    %c0_i32 = arith.constant 0 : i32
    %c0_i32_0 = arith.constant 0 : i32
    %c0_i32_1 = arith.constant 0 : i32
    return %arg0, %c0_i32, %c0_i32_0 : i32, i32, i32
  }
}

module attributes {stable_mosaic.version = 11 : i64} {
  func.func @_conv_block_kernel(%arg0: i32, %arg1: memref<32x256xf32, #tpu.memory_space<vmem>>, %arg2: memref<32x1xf32, #tpu.memory_space<vmem>>, %arg3: memref<1x256x16xf32, #tpu.memory_space<vmem>>, %arg4: memref<1x32x16xf32, #tpu.memory_space<vmem>>) attributes {dimension_semantics = [#tpu.dimension_semantics<parallel>], iteration_bounds = array<i64: 2>, scalar_prefetch = 0 : i64, scratch_operands = 0 : i64, tpu.core_type = #tpu.core_type<tc>, window_params = [{pipeline_mode = #tpu.pipeline_mode<synchronous>, transform_indices = @transform_0, window_bounds = array<i64: 32, 256>}, {pipeline_mode = #tpu.pipeline_mode<synchronous>, transform_indices = @transform_1, window_bounds = array<i64: 32, 1>}, {transform_indices = @transform_2, window_bounds = array<i64: 1, 256, 16>}, {transform_indices = @transform_3, window_bounds = array<i64: 1, 32, 16>}]} {
    %c0 = arith.constant 0 : index
    %c0_0 = arith.constant 0 : index
    %0 = vector.load %arg1[%c0, %c0_0] : memref<32x256xf32, #tpu.memory_space<vmem>>, vector<32x256xf32>
    %c0_1 = arith.constant 0 : index
    %c0_2 = arith.constant 0 : index
    %c0_3 = arith.constant 0 : index
    %1 = vector.load %arg3[%c0_1, %c0_2, %c0_3] : memref<1x256x16xf32, #tpu.memory_space<vmem>>, vector<1x256x16xf32>
    %2 = vector.shape_cast %1 : vector<1x256x16xf32> to vector<256x16xf32>
    %cst = arith.constant dense<0.000000e+00> : vector<32x16xf32>
    %3 = tpu.matmul %0, %2, %cst {dimension_numbers = #tpu.dot_dimension_numbers<[1], [0], [0], [1], [0, 0, 1, 1], [], []>} : vector<32x256xf32>, vector<256x16xf32>, vector<32x16xf32> -> vector<32x16xf32>
    %c0_4 = arith.constant 0 : index
    %c0_5 = arith.constant 0 : index
    %4 = vector.load %arg2[%c0_4, %c0_5] : memref<32x1xf32, #tpu.memory_space<vmem>>, vector<32x1xf32>
    %5 = vector.broadcast %4 : vector<32x1xf32> to vector<32x16xf32>
    %6 = arith.addf %3, %5 : vector<32x16xf32>
    %cst_6 = arith.constant dense<0.000000e+00> : vector<32xf32>
    %7 = vector.multi_reduction <add>, %6, %cst_6 [1] : vector<32x16xf32> to vector<32xf32>
    %8 = vector.shape_cast %7 : vector<32xf32> to vector<32x1xf32>
    %cst_7 = arith.constant 1.600000e+01 : f32
    %9 = vector.broadcast %cst_7 : f32 to vector<32x1xf32>
    %10 = arith.divf %8, %9 : vector<32x1xf32>
    %11 = arith.mulf %6, %6 : vector<32x16xf32>
    %cst_8 = arith.constant dense<0.000000e+00> : vector<32xf32>
    %12 = vector.multi_reduction <add>, %11, %cst_8 [1] : vector<32x16xf32> to vector<32xf32>
    %13 = vector.shape_cast %12 : vector<32xf32> to vector<32x1xf32>
    %cst_9 = arith.constant 1.600000e+01 : f32
    %14 = vector.broadcast %cst_9 : f32 to vector<32x1xf32>
    %15 = arith.divf %13, %14 : vector<32x1xf32>
    %16 = arith.mulf %10, %10 : vector<32x1xf32>
    %17 = arith.subf %15, %16 : vector<32x1xf32>
    %cst_10 = arith.constant 0.000000e+00 : f32
    %18 = vector.broadcast %cst_10 : f32 to vector<32x1xf32>
    %19 = arith.maximumf %17, %18 : vector<32x1xf32>
    %20 = vector.broadcast %10 : vector<32x1xf32> to vector<32x16xf32>
    %21 = arith.subf %6, %20 : vector<32x16xf32>
    %cst_11 = arith.constant 9.99999974E-6 : f32
    %22 = vector.broadcast %cst_11 : f32 to vector<32x1xf32>
    %23 = arith.addf %19, %22 : vector<32x1xf32>
    %24 = math.rsqrt %23 : vector<32x1xf32>
    %25 = vector.broadcast %24 : vector<32x1xf32> to vector<32x16xf32>
    %26 = arith.mulf %21, %25 : vector<32x16xf32>
    %cst_12 = arith.constant 0.000000e+00 : f32
    %27 = vector.broadcast %cst_12 : f32 to vector<32x16xf32>
    %28 = arith.cmpf oge, %26, %27 : vector<32x16xf32>
    %cst_13 = arith.constant 2.000000e-01 : f32
    %29 = vector.broadcast %cst_13 : f32 to vector<32x16xf32>
    %30 = arith.mulf %29, %26 : vector<32x16xf32>
    %31 = arith.select %28, %26, %30 : vector<32x16xi1>, vector<32x16xf32>
    %c0_14 = arith.constant 0 : index
    %c0_15 = arith.constant 0 : index
    %c0_16 = arith.constant 0 : index
    %32 = vector.load %arg4[%c0_14, %c0_15, %c0_16] : memref<1x32x16xf32, #tpu.memory_space<vmem>>, vector<1x32x16xf32>
    %33 = vector.shape_cast %32 : vector<1x32x16xf32> to vector<32x16xf32>
    %34 = vector.shape_cast %31 : vector<32x16xf32> to vector<1x32x16xf32>
    tpu.vector_store %arg4[%c0_14, %c0_15, %c0_16], %34 {strides = array<i32>} : memref<1x32x16xf32, #tpu.memory_space<vmem>>, vector<1x32x16xf32>,
    return
  }
  func.func @transform_0(%arg0: i32) -> (i32, i32) {
    %c0_i32 = arith.constant 0 : i32
    %c0_i32_0 = arith.constant 0 : i32
    %c0_i32_1 = arith.constant 0 : i32
    return %c0_i32, %c0_i32_0 : i32, i32
  }
  func.func @transform_1(%arg0: i32) -> (i32, i32) {
    %c0_i32 = arith.constant 0 : i32
    %c0_i32_0 = arith.constant 0 : i32
    %c0_i32_1 = arith.constant 0 : i32
    return %c0_i32, %c0_i32_0 : i32, i32
  }
  func.func @transform_2(%arg0: i32) -> (i32, i32, i32) {
    %c0_i32 = arith.constant 0 : i32
    %c0_i32_0 = arith.constant 0 : i32
    %c0_i32_1 = arith.constant 0 : i32
    return %arg0, %c0_i32, %c0_i32_0 : i32, i32, i32
  }
  func.func @transform_3(%arg0: i32) -> (i32, i32, i32) {
    %c0_i32 = arith.constant 0 : i32
    %c0_i32_0 = arith.constant 0 : i32
    %c0_i32_1 = arith.constant 0 : i32
    return %arg0, %c0_i32, %c0_i32_0 : i32, i32, i32
  }
}

module attributes {stable_mosaic.version = 11 : i64} {
  func.func @_conv_block_kernel(%arg0: i32, %arg1: memref<64x512xf32, #tpu.memory_space<vmem>>, %arg2: memref<64x1xf32, #tpu.memory_space<vmem>>, %arg3: memref<1x512x9xf32, #tpu.memory_space<vmem>>, %arg4: memref<1x64x9xf32, #tpu.memory_space<vmem>>) attributes {dimension_semantics = [#tpu.dimension_semantics<parallel>], iteration_bounds = array<i64: 2>, scalar_prefetch = 0 : i64, scratch_operands = 0 : i64, tpu.core_type = #tpu.core_type<tc>, window_params = [{pipeline_mode = #tpu.pipeline_mode<synchronous>, transform_indices = @transform_0, window_bounds = array<i64: 64, 512>}, {pipeline_mode = #tpu.pipeline_mode<synchronous>, transform_indices = @transform_1, window_bounds = array<i64: 64, 1>}, {transform_indices = @transform_2, window_bounds = array<i64: 1, 512, 9>}, {transform_indices = @transform_3, window_bounds = array<i64: 1, 64, 9>}]} {
    %c0 = arith.constant 0 : index
    %c0_0 = arith.constant 0 : index
    %0 = vector.load %arg1[%c0, %c0_0] : memref<64x512xf32, #tpu.memory_space<vmem>>, vector<64x512xf32>
    %c0_1 = arith.constant 0 : index
    %c0_2 = arith.constant 0 : index
    %c0_3 = arith.constant 0 : index
    %1 = vector.load %arg3[%c0_1, %c0_2, %c0_3] : memref<1x512x9xf32, #tpu.memory_space<vmem>>, vector<1x512x9xf32>
    %2 = vector.shape_cast %1 : vector<1x512x9xf32> to vector<512x9xf32>
    %cst = arith.constant dense<0.000000e+00> : vector<64x9xf32>
    %3 = tpu.matmul %0, %2, %cst {dimension_numbers = #tpu.dot_dimension_numbers<[1], [0], [0], [1], [0, 0, 1, 1], [], []>} : vector<64x512xf32>, vector<512x9xf32>, vector<64x9xf32> -> vector<64x9xf32>
    %c0_4 = arith.constant 0 : index
    %c0_5 = arith.constant 0 : index
    %4 = vector.load %arg2[%c0_4, %c0_5] : memref<64x1xf32, #tpu.memory_space<vmem>>, vector<64x1xf32>
    %5 = vector.broadcast %4 : vector<64x1xf32> to vector<64x9xf32>
    %6 = arith.addf %3, %5 : vector<64x9xf32>
    %cst_6 = arith.constant dense<0.000000e+00> : vector<64xf32>
    %7 = vector.multi_reduction <add>, %6, %cst_6 [1] : vector<64x9xf32> to vector<64xf32>
    %8 = vector.shape_cast %7 : vector<64xf32> to vector<64x1xf32>
    %cst_7 = arith.constant 9.000000e+00 : f32
    %9 = vector.broadcast %cst_7 : f32 to vector<64x1xf32>
    %10 = arith.divf %8, %9 : vector<64x1xf32>
    %11 = arith.mulf %6, %6 : vector<64x9xf32>
    %cst_8 = arith.constant dense<0.000000e+00> : vector<64xf32>
    %12 = vector.multi_reduction <add>, %11, %cst_8 [1] : vector<64x9xf32> to vector<64xf32>
    %13 = vector.shape_cast %12 : vector<64xf32> to vector<64x1xf32>
    %cst_9 = arith.constant 9.000000e+00 : f32
    %14 = vector.broadcast %cst_9 : f32 to vector<64x1xf32>
    %15 = arith.divf %13, %14 : vector<64x1xf32>
    %16 = arith.mulf %10, %10 : vector<64x1xf32>
    %17 = arith.subf %15, %16 : vector<64x1xf32>
    %cst_10 = arith.constant 0.000000e+00 : f32
    %18 = vector.broadcast %cst_10 : f32 to vector<64x1xf32>
    %19 = arith.maximumf %17, %18 : vector<64x1xf32>
    %20 = vector.broadcast %10 : vector<64x1xf32> to vector<64x9xf32>
    %21 = arith.subf %6, %20 : vector<64x9xf32>
    %cst_11 = arith.constant 9.99999974E-6 : f32
    %22 = vector.broadcast %cst_11 : f32 to vector<64x1xf32>
    %23 = arith.addf %19, %22 : vector<64x1xf32>
    %24 = math.rsqrt %23 : vector<64x1xf32>
    %25 = vector.broadcast %24 : vector<64x1xf32> to vector<64x9xf32>
    %26 = arith.mulf %21, %25 : vector<64x9xf32>
    %cst_12 = arith.constant 0.000000e+00 : f32
    %27 = vector.broadcast %cst_12 : f32 to vector<64x9xf32>
    %28 = arith.cmpf oge, %26, %27 : vector<64x9xf32>
    %cst_13 = arith.constant 2.000000e-01 : f32
    %29 = vector.broadcast %cst_13 : f32 to vector<64x9xf32>
    %30 = arith.mulf %29, %26 : vector<64x9xf32>
    %31 = arith.select %28, %26, %30 : vector<64x9xi1>, vector<64x9xf32>
    %c0_14 = arith.constant 0 : index
    %c0_15 = arith.constant 0 : index
    %c0_16 = arith.constant 0 : index
    %32 = vector.load %arg4[%c0_14, %c0_15, %c0_16] : memref<1x64x9xf32, #tpu.memory_space<vmem>>, vector<1x64x9xf32>
    %33 = vector.shape_cast %32 : vector<1x64x9xf32> to vector<64x9xf32>
    %34 = vector.shape_cast %31 : vector<64x9xf32> to vector<1x64x9xf32>
    tpu.vector_store %arg4[%c0_14, %c0_15, %c0_16], %34 {strides = array<i32>} : memref<1x64x9xf32, #tpu.memory_space<vmem>>, vector<1x64x9xf32>,
    return
  }
  func.func @transform_0(%arg0: i32) -> (i32, i32) {
    %c0_i32 = arith.constant 0 : i32
    %c0_i32_0 = arith.constant 0 : i32
    %c0_i32_1 = arith.constant 0 : i32
    return %c0_i32, %c0_i32_0 : i32, i32
  }
  func.func @transform_1(%arg0: i32) -> (i32, i32) {
    %c0_i32 = arith.constant 0 : i32
    %c0_i32_0 = arith.constant 0 : i32
    %c0_i32_1 = arith.constant 0 : i32
    return %c0_i32, %c0_i32_0 : i32, i32
  }
  func.func @transform_2(%arg0: i32) -> (i32, i32, i32) {
    %c0_i32 = arith.constant 0 : i32
    %c0_i32_0 = arith.constant 0 : i32
    %c0_i32_1 = arith.constant 0 : i32
    return %arg0, %c0_i32, %c0_i32_0 : i32, i32, i32
  }
  func.func @transform_3(%arg0: i32) -> (i32, i32, i32) {
    %c0_i32 = arith.constant 0 : i32
    %c0_i32_0 = arith.constant 0 : i32
    %c0_i32_1 = arith.constant 0 : i32
    return %arg0, %c0_i32, %c0_i32_0 : i32, i32, i32
  }
}

module attributes {stable_mosaic.version = 11 : i64} {
  func.func @_conv_block_kernel(%arg0: i32, %arg1: memref<1x1024xf32, #tpu.memory_space<vmem>>, %arg2: memref<1x1xf32, #tpu.memory_space<vmem>>, %arg3: memref<1x1024x4xf32, #tpu.memory_space<vmem>>, %arg4: memref<1x1x4xf32, #tpu.memory_space<vmem>>) attributes {dimension_semantics = [#tpu.dimension_semantics<parallel>], iteration_bounds = array<i64: 2>, scalar_prefetch = 0 : i64, scratch_operands = 0 : i64, tpu.core_type = #tpu.core_type<tc>, window_params = [{pipeline_mode = #tpu.pipeline_mode<synchronous>, transform_indices = @transform_0, window_bounds = array<i64: 1, 1024>}, {pipeline_mode = #tpu.pipeline_mode<synchronous>, transform_indices = @transform_1, window_bounds = array<i64: 1, 1>}, {transform_indices = @transform_2, window_bounds = array<i64: 1, 1024, 4>}, {transform_indices = @transform_3, window_bounds = array<i64: 1, 1, 4>}]} {
    %c0 = arith.constant 0 : index
    %c0_0 = arith.constant 0 : index
    %0 = vector.load %arg1[%c0, %c0_0] : memref<1x1024xf32, #tpu.memory_space<vmem>>, vector<1x1024xf32>
    %c0_1 = arith.constant 0 : index
    %c0_2 = arith.constant 0 : index
    %c0_3 = arith.constant 0 : index
    %1 = vector.load %arg3[%c0_1, %c0_2, %c0_3] : memref<1x1024x4xf32, #tpu.memory_space<vmem>>, vector<1x1024x4xf32>
    %2 = vector.shape_cast %1 : vector<1x1024x4xf32> to vector<1024x4xf32>
    %cst = arith.constant dense<0.000000e+00> : vector<1x4xf32>
    %3 = tpu.matmul %0, %2, %cst {dimension_numbers = #tpu.dot_dimension_numbers<[1], [0], [0], [1], [0, 0, 1, 1], [], []>} : vector<1x1024xf32>, vector<1024x4xf32>, vector<1x4xf32> -> vector<1x4xf32>
    %c0_4 = arith.constant 0 : index
    %c0_5 = arith.constant 0 : index
    %4 = vector.load %arg2[%c0_4, %c0_5] : memref<1x1xf32, #tpu.memory_space<vmem>>, vector<1x1xf32>
    %5 = vector.broadcast %4 : vector<1x1xf32> to vector<1x4xf32>
    %6 = arith.addf %3, %5 : vector<1x4xf32>
    %c0_6 = arith.constant 0 : index
    %c0_7 = arith.constant 0 : index
    %c0_8 = arith.constant 0 : index
    %7 = vector.load %arg4[%c0_6, %c0_7, %c0_8] : memref<1x1x4xf32, #tpu.memory_space<vmem>>, vector<1x1x4xf32>
    %8 = vector.shape_cast %7 : vector<1x1x4xf32> to vector<1x4xf32>
    %9 = vector.shape_cast %6 : vector<1x4xf32> to vector<1x1x4xf32>
    tpu.vector_store %arg4[%c0_6, %c0_7, %c0_8], %9 {strides = array<i32>} : memref<1x1x4xf32, #tpu.memory_space<vmem>>, vector<1x1x4xf32>,
    return
  }
  func.func @transform_0(%arg0: i32) -> (i32, i32) {
    %c0_i32 = arith.constant 0 : i32
    %c0_i32_0 = arith.constant 0 : i32
    %c0_i32_1 = arith.constant 0 : i32
    return %c0_i32, %c0_i32_0 : i32, i32
  }
  func.func @transform_1(%arg0: i32) -> (i32, i32) {
    %c0_i32 = arith.constant 0 : i32
    %c0_i32_0 = arith.constant 0 : i32
    %c0_i32_1 = arith.constant 0 : i32
    return %c0_i32, %c0_i32_0 : i32, i32
  }
  func.func @transform_2(%arg0: i32) -> (i32, i32, i32) {
    %c0_i32 = arith.constant 0 : i32
    %c0_i32_0 = arith.constant 0 : i32
    %c0_i32_1 = arith.constant 0 : i32
    return %arg0, %c0_i32, %c0_i32_0 : i32, i32, i32
  }
  func.func @transform_3(%arg0: i32) -> (i32, i32, i32) {
    %c0_i32 = arith.constant 0 : i32
    %c0_i32_0 = arith.constant 0 : i32
    %c0_i32_1 = arith.constant 0 : i32
    return %arg0, %c0_i32, %c0_i32_0 : i32, i32, i32
  }
}

</mosaic_0001>

<bundles_post_ra>
// kernel: patchgan_discriminator.5
= control target key start
LH: loop header
LB: loop body
LE: loop exit
PB: predicated region body
PF: predicated region fallthrough
CT: control target
= control target key end

     0   :  { %s394_s12 = smov 0   ;;  %s421_s0 = inlined_call_operand.vmem [shape: f32[8,48], index: 0, kind: input, shape index: {}]   ;;  %s422_s1 = inlined_call_operand.vmem [shape: f32[8,1], index: 1, kind: input, shape index: {}]   ;;  %s423_s2 = inlined_call_operand.vmem [shape: f32[2,48,256], index: 2, kind: input, shape index: {}]   ;;  %s424_s3 = inlined_call_operand.vmem [shape: f32[2,8,256], index: 3, kind: output, shape index: {}]  }
   0x1 LB: > { %s328_s13 = sadd.s32 4294967295, %s370_s12   ;;  %p332_p0 = scmp.ge.s32.totalorder %s370_s12, 1  ;;  %s370_s12 = sphi %s394_s12, %s13_s12  }
   0x2   : > { %p137_p1 = scmp.lt.s32.totalorder %s370_s12, 3 }
   0x4   : > { %p138_p2 = pnand %p332_p0, %p137_p1 }
   0x5   : > { %p161_p3 = scmp.lt.s32.totalorder (!%p138_p2), %s328_s13, 1  ;;  %v184_v0 = vld [vmem:[%s422_s1] sm:$0xff] (!%p138_p2)  ;;  %v372_v1 = vmov (!%p138_p2), 0.0   ;;  %v373_v2 = vmov (!%p138_p2), 0   ;;  %vm190_vm0 = vcmask (!%p138_p2), 392192  }
   0x6   : > { %141 = sbr.rel (%p138_p2) target bundleno = 251 (0xfb), region = 32  ;;  %258 = vmatprep.mubr.f32.mxu0 (!%p138_p2), %v372_v1  ;;  %363 = vset.pattern.permute.xlu0 (!%p138_p2), %v373_v2  ;;  %v171_v21 = vld [vmem:[%s421_s0] sm:$0xff] (!%p138_p2) }
   0x7   : > { %187 = vperm.xlu0 (!%p138_p2), %363, %v184_v0  }
   0xd   : > { %s426_s13 = smov (!%p161_p3, %s328_s13), 1 }
   0xe   : > { %s352_s16 = smul.u32 96, %s426_s13  ;;  %s339_s22 = sshll.u32 %s426_s13, 4 }
   0xf   : > { %s170_s25 = scalar_lea.vmem %s424_s3, %s339_s22 }
  0x10   : > { %s165_s19 = scalar_lea.vmem %s423_s2, %s352_s16 }
  0x11   : > { %v173_v3 = vld [vmem:[%s165_s19 + $0x8] sm:$0xff]  ;;  %v175_v4 = vld [vmem:[%s165_s19 + $0x18] sm:$0xff]  ;;  %v172_v5 = vld [vmem:[%s165_s19] sm:$0xff] }
  0x12   : > { %v340_v6 = vpack.c.bf16 %v175_v4, %v173_v3  ;;  %v174_v7 = vld [vmem:[%s165_s19 + $0x10] sm:$0xff]  ;;  %v177_v8 = vld [vmem:[%s165_s19 + $0x28] sm:$0xff]  ;;  %v179_v9 = vld [vmem:[%s165_s19 + $0x38] sm:$0xff] }
  0x13   : > { %v342_v10 = vpack.c.bf16 %v174_v7, %v172_v5  ;;  %v344_v11 = vpack.c.bf16 %v179_v9, %v177_v8  ;;  %v176_v12 = vld [vmem:[%s165_s19 + $0x20] sm:$0xff]  ;;  %v178_v13 = vld [vmem:[%s165_s19 + $0x30] sm:$0xff]  ;;  %v181_v14 = vld [vmem:[%s165_s19 + $0x48] sm:$0xff] }
  0x14   : > { %341 = vmatprep.subr.bf16.mxu0 %v340_v6  ;;  %v183_v15 = vld [vmem:[%s165_s19 + $0x58] sm:$0xff]  ;;  %v346_v16 = vpack.c.bf16 %v178_v13, %v176_v12  ;;  %v180_v18 = vld [vmem:[%s165_s19 + $0x40] sm:$0xff]  ;;  %v182_v19 = vld [vmem:[%s165_s19 + $0x50] sm:$0xff] }
  0x15   : > { %343 = vmatpush1.bf16.msra.mxu0 %v342_v10  ;;  %v348_v17 = vpack.c.bf16 %v183_v15, %v181_v14  ;;  %v350_v20 = vpack.c.bf16 %v182_v19, %v180_v18 }
  0x16   : > { %345 = vmatprep.subr.bf16.mxu0 %v344_v11 }
  0x19   : > { %347 = vmatpush1.bf16.msra.mxu0 %v346_v16 }
  0x1a   : > { %349 = vmatprep.subr.bf16.mxu0 %v348_v17 }
  0x1d   : > { %351 = vmatpush1.bf16.msra.mxu0 %v350_v20 }
  0x20   : > { %336 = vmatmul.mubr.msk.f32.vlgmr.msra.gmra.mrb[0].mxu0 %vm190_vm0, %v171_v21 }
  0x86   : > { %v188_v22 = vpop.permute.xlu0 %187 }
  0xf3   : > { %v260_v23 = vpop.f32.mrb[0].mxu0 }
  0xf4   : > { %v261_v24 = vadd.f32 %v260_v23, %v188_v22  ;;  %v262_v25 = vpop.f32.mrb[1].mxu0 }
  0xf5   : > { %v263_v26 = vadd.f32 %v262_v25, %v188_v22 }
  0xf6   : > { %vm265_vm1 = vcmp.ge.f32.partialorder %v261_v24, 0.0  ;;  %v267_v27 = vmul.f32 0.2, %v261_v24 }
  0xf7   : > { %vm266_vm2 = vcmp.ge.f32.partialorder %v263_v26, 0.0  ;;  %v268_v28 = vmul.f32 0.2, %v263_v26 }
  0xf8   : > { %v269_v29 = vsel %vm265_vm1, %v261_v24, %v267_v27 }
  0xf9   : > { %271 = vst [vmem:[%s170_s25] sm:$0xff] %v269_v29  ;;  %v270_v30 = vsel %vm266_vm2, %v263_v26, %v268_v28 }
  0xfa   : > { %272 = vst [vmem:[%s170_s25 + $0x8] sm:$0xff] %v270_v30 }
  0xfb PF: > { %s13_s12 = sadd.s32 1, %s370_s12  }
  0xfc   : > { %p10_p4 = scmp.ge.s32.totalorder %s13_s12, 4  }
  0xfe   :  { %12 = sbr.rel (!%p10_p4) target bundleno = 1 (0x1), region = 62 }

// kernel: patchgan_discriminator.6
= control target key start
LH: loop header
LB: loop body
LE: loop exit
PB: predicated region body
PF: predicated region fallthrough
CT: control target
= control target key end

     0   :  { %s514_s12 = smov 0   ;;  %s571_s0 = inlined_call_operand.vmem [shape: f32[16,128], index: 0, kind: input, shape index: {}]   ;;  %s572_s1 = inlined_call_operand.vmem [shape: f32[16,1], index: 1, kind: input, shape index: {}]   ;;  %s573_s2 = inlined_call_operand.vmem [shape: f32[2,128,64], index: 2, kind: input, shape index: {}]   ;;  %s574_s3 = inlined_call_operand.vmem [shape: f32[2,16,64], index: 3, kind: output, shape index: {}]  }
   0x1 LB: > { %s373_s13 = sadd.s32 4294967295, %s491_s12   ;;  %p377_p0 = scmp.ge.s32.totalorder %s491_s12, 1  ;;  %s491_s12 = sphi %s514_s12, %s13_s12  }
   0x2   : > { %p137_p1 = scmp.lt.s32.totalorder %s491_s12, 3 }
   0x4   : > { %p138_p2 = pnand %p377_p0, %p137_p1 }
   0x5   : > { %p161_p3 = scmp.lt.s32.totalorder (!%p138_p2), %s373_s13, 1  ;;  %v171_v0 = vld [vmem:[%s571_s0] sm:$0xff] (!%p138_p2)  ;;  %v493_v2 = vmov (!%p138_p2), 0   ;;  %v190_v3 = vld [vmem:[%s572_s1 + $0x8] sm:$0xff] (!%p138_p2)  ;;  %vm276_vm0 = vcmask (!%p138_p2), 523264  }
   0x6   : > { %141 = sbr.rel (%p138_p2) target bundleno = 441 (0x1b9), region = 32  ;;  %v189_v1 = vld [vmem:[%s572_s1] sm:$0xff] (!%p138_p2)  ;;  %436 = vmatprep.mubr.f32.mxu0 (!%p138_p2), %v171_v0  ;;  %480 = vset.pattern.permute.xlu0 (!%p138_p2), %v493_v2  ;;  %v172_v28 = vld [vmem:[%s571_s0 + $0x8] sm:$0xff] (!%p138_p2) }
   0x7   : > { %193 = vperm.xlu0 (!%p138_p2), %480, %v189_v1  }
   0xb   : > { %198 = vperm.xlu0 (!%p138_p2), %480, %v190_v3  }
   0xd   : > { %s576_s13 = smov (!%p161_p3, %s373_s13), 1 }
   0xe   : > { %s384_s20 = sshll.u32 %s576_s13, 7  ;;  %s385_s26 = sshll.u32 %s576_s13, 4 }
   0xf   : > { %s537_s23 = scalar_lea.vmem %s573_s2, %s384_s20  ;;  %s170_s29 = scalar_lea.vmem %s574_s3, %s385_s26 }
  0x10   : > { %v173_v4 = vld [vmem:[%s537_s23] sm:$0xff]  ;;  %v174_v5 = vld [vmem:[%s537_s23 + $0x8] sm:$0xff]  ;;  %v175_v6 = vld [vmem:[%s537_s23 + $0x10] sm:$0xff] }
  0x11   : > { %v439_v7 = vpack.c.bf16 %v174_v5, %v173_v4  ;;  %v176_v8 = vld [vmem:[%s537_s23 + $0x18] sm:$0xff]  ;;  %v177_v10 = vld [vmem:[%s537_s23 + $0x20] sm:$0xff]  ;;  %v178_v11 = vld [vmem:[%s537_s23 + $0x28] sm:$0xff] }
  0x12   : > { %v443_v9 = vpack.c.bf16 %v176_v8, %v175_v6  ;;  %v447_v12 = vpack.c.bf16 %v178_v11, %v177_v10  ;;  %v179_v13 = vld [vmem:[%s537_s23 + $0x30] sm:$0xff]  ;;  %v180_v14 = vld [vmem:[%s537_s23 + $0x38] sm:$0xff]  ;;  %v181_v16 = vld [vmem:[%s537_s23 + $0x40] sm:$0xff] }
  0x13   : > { %440 = vmatprep.subr.bf16.mxu0 %v439_v7  ;;  %v451_v15 = vpack.c.bf16 %v180_v14, %v179_v13  ;;  %v182_v17 = vld [vmem:[%s537_s23 + $0x48] sm:$0xff]  ;;  %v183_v19 = vld [vmem:[%s537_s23 + $0x50] sm:$0xff]  ;;  %v184_v20 = vld [vmem:[%s537_s23 + $0x58] sm:$0xff] }
  0x14   : > { %442 = vmatpush3.bf16.msra.mxu0 %v439_v7  ;;  %v455_v18 = vpack.c.bf16 %v182_v17, %v181_v16  ;;  %v459_v21 = vpack.c.bf16 %v184_v20, %v183_v19  ;;  %v185_v22 = vld [vmem:[%s537_s23 + $0x60] sm:$0xff]  ;;  %v186_v23 = vld [vmem:[%s537_s23 + $0x68] sm:$0xff]  ;;  %v187_v25 = vld [vmem:[%s537_s23 + $0x70] sm:$0xff] }
  0x15   : > { %444 = vmatprep.subr.bf16.mxu0 %v443_v9  ;;  %v463_v24 = vpack.c.bf16 %v186_v23, %v185_v22  ;;  %v188_v26 = vld [vmem:[%s537_s23 + $0x78] sm:$0xff] }
  0x16   : > { %v467_v27 = vpack.c.bf16 %v188_v26, %v187_v25 }
  0x18   : > { %446 = vmatpush3.bf16.msra.mxu0 %v443_v9 }
  0x19   : > { %448 = vmatprep.subr.bf16.mxu0 %v447_v12 }
  0x1c   : > { %450 = vmatpush3.bf16.msra.mxu0 %v447_v12 }
  0x1d   : > { %452 = vmatprep.subr.bf16.mxu0 %v451_v15 }
  0x20   : > { %454 = vmatpush3.bf16.msra.mxu0 %v451_v15 }
  0x21   : > { %456 = vmatprep.subr.bf16.mxu0 %v455_v18 }
  0x24   : > { %458 = vmatpush3.bf16.msra.mxu0 %v455_v18 }
  0x25   : > { %460 = vmatprep.subr.bf16.mxu0 %v459_v21 }
  0x28   : > { %462 = vmatpush3.bf16.msra.mxu0 %v459_v21 }
  0x29   : > { %464 = vmatprep.subr.bf16.mxu0 %v463_v24 }
  0x2c   : > { %466 = vmatpush3.bf16.msra.mxu0 %v463_v24 }
  0x2d   : > { %468 = vmatprep.subr.bf16.mxu0 %v467_v27 }
  0x30   : > { %470 = vmatpush3.bf16.msra.mxu0 %v467_v27 }
  0x33   : > { %437 = vmatmul.mubr.f32.vlgmr.msra.gmra.mrb[0].mxu0 %v172_v28 }
  0x86   : > { %v194_v29 = vpop.permute.xlu0 %193 }
  0x8a   : > { %v199_v30 = vpop.permute.xlu0 %198 }
 0x106   : > { %v438_v31 = vpop.f32.mrb[0].mxu0 }
 0x107   : > { %v273_v32 = vadd.f32 %v438_v31, %v199_v30  ;;  %v267_v33 = vpop.f32.mrb[1].mxu0 }
 0x108   : > { %v268_v34 = vadd.f32 %v267_v33, %v194_v29 }
 0x109   : > { %v280_v35 = vsel %vm276_vm0, %v273_v32, 0.0  ;;  %v287_v39 = vmul.f32 %v273_v32, %v273_v32 }
 0x10a   : > { %281 = vadd.xlane.f32.xlu1 %v280_v35  ;;  %v286_v36 = vmul.f32 %v268_v34, %v268_v34  ;;  %v277_v38 = vsel %vm276_vm0, %v268_v34, 0.0 }
 0x10b   : > { %v291_v40 = vsel %vm276_vm0, %v287_v39, 0.0 }
 0x10c   : > { %v288_v37 = vsel %vm276_vm0, %v286_v36, 0.0 }
 0x10d   : > { %289 = vadd.xlane.f32.xlu0 %v288_v37 }
 0x10e   : > { %278 = vadd.xlane.f32.xlu1 %v277_v38 }
 0x112   : > { %292 = vadd.xlane.f32.xlu1 %v291_v40 }
 0x197   : > { %v282_v41 = vpop.xlane.xlu1 %281 }
 0x198   : > { %v285_v44 = vmul.f32 0.015625, %v282_v41 }
 0x19a   : > { %v290_v42 = vpop.xlane.xlu0 %289  ;;  %v297_v49 = vmul.f32 %v285_v44, %v285_v44  ;;  %v303_v59 = vsub.f32 %v273_v32, %v285_v44 }
 0x19b   : > { %v279_v43 = vpop.xlane.xlu1 %278  ;;  %v294_v46 = vmul.f32 0.015625, %v290_v42 }
 0x19c   : > { %v284_v45 = vmul.f32 0.015625, %v279_v43 }
 0x19e   : > { %v296_v47 = vmul.f32 %v284_v45, %v284_v45  ;;  %v302_v57 = vsub.f32 %v268_v34, %v284_v45 }
 0x19f   : > { %v293_v48 = vpop.xlane.xlu1 %292 }
 0x1a0   : > { %v298_v50 = vsub.f32 %v294_v46, %v296_v47  ;;  %v295_v51 = vmul.f32 0.015625, %v293_v48 }
 0x1a2   : > { %v300_v52 = vmax.f32 %v298_v50, 0.0  ;;  %v299_v53 = vsub.f32 %v295_v51, %v297_v49 }
 0x1a4   : > { %v304_v54 = vadd.f32 1e-05, %v300_v52  ;;  %v301_v55 = vmax.f32 %v299_v53, 0.0 }
 0x1a6   : > { %481 = vrsqrt.f32 %v304_v54  ;;  %v305_v56 = vadd.f32 1e-05, %v301_v55 }
 0x1a8   : > { %483 = vrsqrt.f32 %v305_v56 }
 0x1b0   : > { %v482_v58 = vpop.eup %481 }
 0x1b1   : > { %v308_v60 = vmul.f32 %v482_v58, %v302_v57 }
 0x1b2   : > { %v484_v61 = vpop.eup %483 }
 0x1b3   : > { %vm310_vm1 = vcmp.ge.f32.partialorder %v308_v60, 0.0  ;;  %v312_v62 = vmul.f32 0.2, %v308_v60  ;;  %v309_v63 = vmul.f32 %v484_v61, %v303_v59 }
 0x1b5   : > { %v314_v0 = vsel %vm310_vm1, %v308_v60, %v312_v62  ;;  %vm311_vm2 = vcmp.ge.f32.partialorder %v309_v63, 0.0  ;;  %v313_v1 = vmul.f32 0.2, %v309_v63 }
 0x1b6   : > { %316 = vst.msk [vmem:[%s170_s29] sm:$0xff] %vm276_vm0, %v314_v0 }
 0x1b7   : > { %v315_v2 = vsel %vm311_vm2, %v309_v63, %v313_v1 }
 0x1b8   : > { %317 = vst.msk [vmem:[%s170_s29 + $0x8] sm:$0xff] %vm276_vm0, %v315_v2 }
 0x1b9 PF: > { %s13_s12 = sadd.s32 1, %s491_s12  }
 0x1ba   : > { %p10_p4 = scmp.ge.s32.totalorder %s13_s12, 4  }
 0x1bc   :  { %12 = sbr.rel (!%p10_p4) target bundleno = 1 (0x1), region = 62 }

// kernel: patchgan_discriminator.7
= control target key start
LH: loop header
LB: loop body
LE: loop exit
PB: predicated region body
PF: predicated region fallthrough
CT: control target
= control target key end

     0   :  { %s610_s12 = smov 0   ;;  %s737_s0 = inlined_call_operand.vmem [shape: f32[32,256], index: 0, kind: input, shape index: {}]   ;;  %s738_s1 = inlined_call_operand.vmem [shape: f32[32,1], index: 1, kind: input, shape index: {}]   ;;  %s739_s2 = inlined_call_operand.vmem [shape: f32[2,256,16], index: 2, kind: input, shape index: {}]   ;;  %s740_s3 = inlined_call_operand.vmem [shape: f32[2,32,16], index: 3, kind: output, shape index: {}]  }
   0x1 LB: > { %s457_s13 = sadd.s32 4294967295, %s587_s12   ;;  %p461_p0 = scmp.ge.s32.totalorder %s587_s12, 1  ;;  %s587_s12 = sphi %s610_s12, %s13_s12  }
   0x2   : > { %p137_p1 = scmp.lt.s32.totalorder %s587_s12, 3 }
   0x4   : > { %p138_p2 = pnand %p461_p0, %p137_p1 }
   0x5   : > { %p161_p3 = scmp.lt.s32.totalorder (!%p138_p2), %s457_s13, 1  ;;  %v172_v0 = vld [vmem:[%s737_s0 + $0x8] sm:$0xff] (!%p138_p2)  ;;  %v589_v2 = vmov (!%p138_p2), 0   ;;  %v211_v3 = vld [vmem:[%s738_s1] sm:$0xff] (!%p138_p2)  ;;  %v213_v4 = vld [vmem:[%s738_s1 + $0x10] sm:$0xff] (!%p138_p2)  ;;  %vm320_vm0 = vcmask (!%p138_p2), 130048  }
   0x6   : > { %141 = sbr.rel (%p138_p2) target bundleno = 452 (0x1c4), region = 32  ;;  %v176_v1 = vld [vmem:[%s737_s0 + $0x28] sm:$0xff] (!%p138_p2)  ;;  %299 = vmatprep.mubr.f32.mxu0 (!%p138_p2), %v172_v0  ;;  %571 = vset.pattern.permute.xlu0 (!%p138_p2), %v589_v2  ;;  %v214_v6 = vld [vmem:[%s738_s1 + $0x18] sm:$0xff] (!%p138_p2)  ;;  %v171_v55 = vld [vmem:[%s737_s0] sm:$0xff] (!%p138_p2) }
   0x7   : > { %309 = vmatprep.mubr.f32.mxu1 (!%p138_p2), %v176_v1  ;;  %572 = vset.pattern.permute.xlu1 (!%p138_p2), %v589_v2  ;;  %v212_v5 = vld [vmem:[%s738_s1 + $0x8] sm:$0xff] (!%p138_p2)  ;;  %v175_v56 = vld [vmem:[%s737_s0 + $0x20] sm:$0xff] (!%p138_p2)  ;;  %v174_v57 = vld [vmem:[%s737_s0 + $0x18] sm:$0xff] (!%p138_p2) }
   0x8   : > { %217 = vperm.xlu0 (!%p138_p2), %571, %v211_v3   ;;  %227 = vperm.xlu1 (!%p138_p2), %572, %v213_v4   ;;  %v178_v58 = vld [vmem:[%s737_s0 + $0x38] sm:$0xff] (!%p138_p2)  ;;  %v173_v59 = vld [vmem:[%s737_s0 + $0x10] sm:$0xff] (!%p138_p2) }
   0x9   : > { %v177_v60 = vld [vmem:[%s737_s0 + $0x30] sm:$0xff] (!%p138_p2) }
   0xc   : > { %222 = vperm.xlu0 (!%p138_p2), %571, %v212_v5   ;;  %232 = vperm.xlu1 (!%p138_p2), %572, %v214_v6  }
   0xd   : > { %s742_s13 = smov (!%p161_p3, %s457_s13), 1 }
   0xe   : > { %s468_s22 = sshll.u32 %s742_s13, 8  ;;  %s469_s17 = sshll.u32 %s742_s13, 5 }
   0xf   : > { %s639_s27 = scalar_lea.vmem %s739_s2, %s468_s22  ;;  %s170_s20 = scalar_lea.vmem %s740_s3, %s469_s17 }
  0x10   : > { %v195_v7 = vld [vmem:[%s639_s27 + $0x80] sm:$0xff]  ;;  %v196_v8 = vld [vmem:[%s639_s27 + $0x88] sm:$0xff]  ;;  %v197_v12 = vld [vmem:[%s639_s27 + $0x90] sm:$0xff] }
  0x11   : > { %v179_v9 = vld [vmem:[%s639_s27] sm:$0xff]  ;;  %v514_v10 = vpack.c.bf16 %v196_v8, %v195_v7  ;;  %v180_v11 = vld [vmem:[%s639_s27 + $0x8] sm:$0xff]  ;;  %v198_v13 = vld [vmem:[%s639_s27 + $0x98] sm:$0xff] }
  0x12   : > { %v516_v14 = vpack.c.bf16 %v180_v11, %v179_v9  ;;  %v518_v15 = vpack.c.bf16 %v198_v13, %v197_v12  ;;  %v181_v16 = vld [vmem:[%s639_s27 + $0x10] sm:$0xff]  ;;  %v182_v17 = vld [vmem:[%s639_s27 + $0x18] sm:$0xff]  ;;  %v199_v18 = vld [vmem:[%s639_s27 + $0xa0] sm:$0xff] }
  0x13   : > { %515 = vmatprep.subr.bf16.mxu0 %v514_v10  ;;  %546 = vmatprep.subr.bf16.mxu1 %v514_v10  ;;  %v200_v19 = vld [vmem:[%s639_s27 + $0xa8] sm:$0xff]  ;;  %v520_v20 = vpack.c.bf16 %v182_v17, %v181_v16  ;;  %v183_v22 = vld [vmem:[%s639_s27 + $0x20] sm:$0xff]  ;;  %v201_v24 = vld [vmem:[%s639_s27 + $0xb0] sm:$0xff] }
  0x14   : > { %517 = vmatpush3.bf16.msra.mxu0 %v516_v14  ;;  %554 = vmatpush3.bf16.msra.mxu1 %v516_v14  ;;  %v522_v21 = vpack.c.bf16 %v200_v19, %v199_v18  ;;  %v184_v23 = vld [vmem:[%s639_s27 + $0x28] sm:$0xff]  ;;  %v202_v25 = vld [vmem:[%s639_s27 + $0xb8] sm:$0xff]  ;;  %v185_v28 = vld [vmem:[%s639_s27 + $0x30] sm:$0xff] }
  0x15   : > { %519 = vmatprep.subr.bf16.mxu0 %v518_v15  ;;  %547 = vmatprep.subr.bf16.mxu1 %v518_v15  ;;  %v524_v26 = vpack.c.bf16 %v184_v23, %v183_v22  ;;  %v526_v27 = vpack.c.bf16 %v202_v25, %v201_v24  ;;  %v186_v29 = vld [vmem:[%s639_s27 + $0x38] sm:$0xff]  ;;  %v203_v30 = vld [vmem:[%s639_s27 + $0xc0] sm:$0xff]  ;;  %v204_v31 = vld [vmem:[%s639_s27 + $0xc8] sm:$0xff] }
  0x16   : > { %v528_v32 = vpack.c.bf16 %v186_v29, %v185_v28  ;;  %v530_v33 = vpack.c.bf16 %v204_v31, %v203_v30  ;;  %v187_v34 = vld [vmem:[%s639_s27 + $0x40] sm:$0xff]  ;;  %v188_v35 = vld [vmem:[%s639_s27 + $0x48] sm:$0xff]  ;;  %v205_v36 = vld [vmem:[%s639_s27 + $0xd0] sm:$0xff] }
  0x17   : > { %v206_v37 = vld [vmem:[%s639_s27 + $0xd8] sm:$0xff]  ;;  %v532_v38 = vpack.c.bf16 %v188_v35, %v187_v34  ;;  %v189_v40 = vld [vmem:[%s639_s27 + $0x50] sm:$0xff]  ;;  %v207_v42 = vld [vmem:[%s639_s27 + $0xe0] sm:$0xff] }
  0x18   : > { %521 = vmatpush3.bf16.msra.mxu0 %v520_v20  ;;  %555 = vmatpush3.bf16.msra.mxu1 %v520_v20  ;;  %v534_v39 = vpack.c.bf16 %v206_v37, %v205_v36  ;;  %v190_v41 = vld [vmem:[%s639_s27 + $0x58] sm:$0xff]  ;;  %v208_v43 = vld [vmem:[%s639_s27 + $0xe8] sm:$0xff]  ;;  %v191_v46 = vld [vmem:[%s639_s27 + $0x60] sm:$0xff] }
  0x19   : > { %523 = vmatprep.subr.bf16.mxu0 %v522_v21  ;;  %548 = vmatprep.subr.bf16.mxu1 %v522_v21  ;;  %v536_v44 = vpack.c.bf16 %v190_v41, %v189_v40  ;;  %v538_v45 = vpack.c.bf16 %v208_v43, %v207_v42  ;;  %v192_v47 = vld [vmem:[%s639_s27 + $0x68] sm:$0xff]  ;;  %v209_v48 = vld [vmem:[%s639_s27 + $0xf0] sm:$0xff]  ;;  %v210_v49 = vld [vmem:[%s639_s27 + $0xf8] sm:$0xff] }
  0x1a   : > { %v540_v50 = vpack.c.bf16 %v192_v47, %v191_v46  ;;  %v542_v51 = vpack.c.bf16 %v210_v49, %v209_v48  ;;  %v193_v52 = vld [vmem:[%s639_s27 + $0x70] sm:$0xff]  ;;  %v194_v53 = vld [vmem:[%s639_s27 + $0x78] sm:$0xff] }
  0x1b   : > { %v544_v54 = vpack.c.bf16 %v194_v53, %v193_v52 }
  0x1c   : > { %525 = vmatpush3.bf16.msra.mxu0 %v524_v26  ;;  %556 = vmatpush3.bf16.msra.mxu1 %v524_v26 }
  0x1d   : > { %527 = vmatprep.subr.bf16.mxu0 %v526_v27  ;;  %549 = vmatprep.subr.bf16.mxu1 %v526_v27 }
  0x20   : > { %529 = vmatpush3.bf16.msra.mxu0 %v528_v32  ;;  %557 = vmatpush3.bf16.msra.mxu1 %v528_v32 }
  0x21   : > { %531 = vmatprep.subr.bf16.mxu0 %v530_v33  ;;  %550 = vmatprep.subr.bf16.mxu1 %v530_v33 }
  0x24   : > { %533 = vmatpush3.bf16.msra.mxu0 %v532_v38  ;;  %558 = vmatpush3.bf16.msra.mxu1 %v532_v38 }
  0x25   : > { %535 = vmatprep.subr.bf16.mxu0 %v534_v39  ;;  %551 = vmatprep.subr.bf16.mxu1 %v534_v39 }
  0x28   : > { %537 = vmatpush3.bf16.msra.mxu0 %v536_v44  ;;  %559 = vmatpush3.bf16.msra.mxu1 %v536_v44 }
  0x29   : > { %539 = vmatprep.subr.bf16.mxu0 %v538_v45  ;;  %552 = vmatprep.subr.bf16.mxu1 %v538_v45 }
  0x2c   : > { %541 = vmatpush3.bf16.msra.mxu0 %v540_v50  ;;  %560 = vmatpush3.bf16.msra.mxu1 %v540_v50 }
  0x2d   : > { %543 = vmatprep.subr.bf16.mxu0 %v542_v51  ;;  %553 = vmatprep.subr.bf16.mxu1 %v542_v51 }
  0x30   : > { %545 = vmatpush3.bf16.msra.mxu0 %v544_v54  ;;  %561 = vmatpush3.bf16.msra.mxu1 %v544_v54 }
  0x33   : > { %300 = vmatmul.mubr.f32.vlgmr.msra.gmra.mrb[0].mxu0 %v171_v55  ;;  %310 = vmatmul.mubr.f32.vlgmr.msra.gmra.mrb[0].mxu1 %v175_v56 }
  0x34   : > { %304 = vmatprep.mubr.f32.mxu0 %v174_v57  ;;  %314 = vmatprep.mubr.f32.mxu1 %v178_v58 }
  0x37   : > { %305 = vmatmul.mubr.f32.gmra.mrb[2].mxu0 %v173_v59  ;;  %315 = vmatmul.mubr.f32.gmra.mrb[2].mxu1 %v177_v60 }
  0x87   : > { %v218_v61 = vpop.permute.xlu0 %217  ;;  %v228_v62 = vpop.permute.xlu1 %227 }
  0x8b   : > { %v223_v15 = vpop.permute.xlu0 %222  ;;  %v233_v16 = vpop.permute.xlu1 %232 }
 0x106   : > { %v502_v63 = vpop.f32.mrb[0].mxu0  ;;  %v508_v0 = vpop.f32.mrb[0].mxu1 }
 0x107   : > { %v503_v1 = vpop.f32.mrb[1].mxu0  ;;  %v509_v2 = vpop.f32.mrb[1].mxu1 }
 0x108   : > { %v504_v3 = vadd.f32 %v503_v1, %v502_v63  ;;  %v510_v4 = vadd.f32 %v509_v2, %v508_v0 }
 0x10a   : > { %v694_v5 = vadd.f32 %v504_v3, %v218_v61  ;;  %v696_v6 = vadd.f32 %v510_v4, %v228_v62  ;;  %v505_v7 = vpop.f32.mrb[2].mxu0  ;;  %v511_v8 = vpop.f32.mrb[2].mxu1 }
 0x10b   : > { %v506_v9 = vpop.f32.mrb[3].mxu0  ;;  %v512_v10 = vpop.f32.mrb[3].mxu1 }
 0x10c   : > { %v507_v11 = vadd.f32 %v506_v9, %v505_v7  ;;  %v513_v12 = vadd.f32 %v512_v10, %v511_v8  ;;  %v321_v13 = vsel %vm320_vm0, %v694_v5, 0.0  ;;  %v338_v14 = vmul.f32 %v694_v5, %v694_v5 }
 0x10d   : > { %322 = vadd.xlane.f32.xlu0 %v321_v13  ;;  %v327_v19 = vsel %vm320_vm0, %v696_v6, 0.0  ;;  %v340_v22 = vmul.f32 %v696_v6, %v696_v6 }
 0x10e   : > { %v702_v17 = vadd.f32 %v507_v11, %v223_v15  ;;  %v342_v18 = vsel %vm320_vm0, %v338_v14, 0.0  ;;  %v707_v20 = vadd.f32 %v513_v12, %v233_v16 }
 0x10f   : > { %343 = vadd.xlane.f32.xlu1 %v342_v18  ;;  %v348_v25 = vsel %vm320_vm0, %v340_v22, 0.0 }
 0x110   : > { %v324_v21 = vsel %vm320_vm0, %v702_v17, 0.0  ;;  %v330_v23 = vsel %vm320_vm0, %v707_v20, 0.0  ;;  %v339_v24 = vmul.f32 %v702_v17, %v702_v17  ;;  %v341_v27 = vmul.f32 %v707_v20, %v707_v20 }
 0x111   : > { %328 = vadd.xlane.f32.xlu0 %v327_v19 }
 0x112   : > { %v345_v26 = vsel %vm320_vm0, %v339_v24, 0.0  ;;  %v351_v28 = vsel %vm320_vm0, %v341_v27, 0.0 }
 0x113   : > { %325 = vadd.xlane.f32.xlu1 %v324_v21 }
 0x115   : > { %331 = vadd.xlane.f32.xlu0 %v330_v23 }
 0x117   : > { %349 = vadd.xlane.f32.xlu1 %v348_v25 }
 0x119   : > { %346 = vadd.xlane.f32.xlu0 %v345_v26 }
 0x11d   : > { %352 = vadd.xlane.f32.xlu0 %v351_v28 }
 0x19a   : > { %v323_v29 = vpop.xlane.xlu0 %322 }
 0x19b   : > { %v334_v30 = vmul.f32 0.0625, %v323_v29 }
 0x19c   : > { %v344_v31 = vpop.xlane.xlu1 %343 }
 0x19d   : > { %v358_v32 = vmul.f32 %v334_v30, %v334_v30  ;;  %v354_v33 = vmul.f32 0.0625, %v344_v31  ;;  %v370_v59 = vsub.f32 %v694_v5, %v334_v30 }
 0x19e   : > { %v329_v34 = vpop.xlane.xlu0 %328 }
 0x19f   : > { %v362_v35 = vsub.f32 %v354_v33, %v358_v32  ;;  %v336_v38 = vmul.f32 0.0625, %v329_v34 }
 0x1a0   : > { %v326_v36 = vpop.xlane.xlu1 %325 }
 0x1a1   : > { %v366_v37 = vmax.f32 %v362_v35, 0.0  ;;  %v335_v41 = vmul.f32 0.0625, %v326_v36  ;;  %v360_v43 = vmul.f32 %v336_v38, %v336_v38  ;;  %v372_v2 = vsub.f32 %v696_v6, %v336_v38 }
 0x1a2   : > { %v332_v39 = vpop.xlane.xlu0 %331 }
 0x1a3   : > { %v374_v40 = vadd.f32 1e-05, %v366_v37  ;;  %v359_v46 = vmul.f32 %v335_v41, %v335_v41  ;;  %v337_v47 = vmul.f32 0.0625, %v332_v39  ;;  %v371_v4 = vsub.f32 %v702_v17, %v335_v41 }
 0x1a4   : > { %v350_v42 = vpop.xlane.xlu1 %349 }
 0x1a5   : > { %573 = vrsqrt.f32 %v374_v40  ;;  %v356_v44 = vmul.f32 0.0625, %v350_v42  ;;  %v361_v53 = vmul.f32 %v337_v47, %v337_v47  ;;  %v373_v10 = vsub.f32 %v707_v20, %v337_v47 }
 0x1a6   : > { %v347_v45 = vpop.xlane.xlu0 %346 }
 0x1a7   : > { %v364_v48 = vsub.f32 %v356_v44, %v360_v43  ;;  %v355_v49 = vmul.f32 0.0625, %v347_v45 }
 0x1a9   : > { %v368_v50 = vmax.f32 %v364_v48, 0.0  ;;  %v363_v51 = vsub.f32 %v355_v49, %v359_v46 }
 0x1aa   : > { %v353_v52 = vpop.xlane.xlu0 %352 }
 0x1ab   : > { %v376_v54 = vadd.f32 1e-05, %v368_v50  ;;  %v367_v55 = vmax.f32 %v363_v51, 0.0  ;;  %v357_v56 = vmul.f32 0.0625, %v353_v52 }
 0x1ad   : > { %575 = vrsqrt.f32 %v376_v54  ;;  %v375_v57 = vadd.f32 1e-05, %v367_v55  ;;  %v365_v58 = vsub.f32 %v357_v56, %v361_v53 }
 0x1af   : > { %v574_v60 = vpop.eup %573  ;;  %577 = vrsqrt.f32 %v375_v57  ;;  %v369_v61 = vmax.f32 %v365_v58, 0.0 }
 0x1b0   : > { %v382_v62 = vmul.f32 %v574_v60, %v370_v59 }
 0x1b1   : > { %v377_v63 = vadd.f32 1e-05, %v369_v61 }
 0x1b2   : > { %vm386_vm1 = vcmp.ge.f32.partialorder %v382_v62, 0.0  ;;  %v390_v0 = vmul.f32 0.2, %v382_v62 }
 0x1b3   : > { %579 = vrsqrt.f32 %v377_v63 }
 0x1b4   : > { %v394_v1 = vsel %vm386_vm1, %v382_v62, %v390_v0 }
 0x1b5   : > { %398 = vst.msk [vmem:[%s170_s20] sm:$0xff] %vm320_vm0, %v394_v1 }
 0x1b7   : > { %v576_v3 = vpop.eup %575 }
 0x1b8   : > { %v384_v5 = vmul.f32 %v576_v3, %v372_v2 }
 0x1b9   : > { %v578_v7 = vpop.eup %577 }
 0x1ba   : > { %vm388_vm2 = vcmp.ge.f32.partialorder %v384_v5, 0.0  ;;  %v392_v8 = vmul.f32 0.2, %v384_v5  ;;  %v383_v9 = vmul.f32 %v578_v7, %v371_v4 }
 0x1bc   : > { %v396_v11 = vsel %vm388_vm2, %v384_v5, %v392_v8  ;;  %vm387_vm3 = vcmp.ge.f32.partialorder %v383_v9, 0.0  ;;  %v391_v12 = vmul.f32 0.2, %v383_v9 }
 0x1bd   : > { %v580_v13 = vpop.eup %579  ;;  %400 = vst.msk [vmem:[%s170_s20 + $0x10] sm:$0xff] %vm320_vm0, %v396_v11 }
 0x1be   : > { %v395_v14 = vsel %vm387_vm3, %v383_v9, %v391_v12  ;;  %v385_v15 = vmul.f32 %v580_v13, %v373_v10 }
 0x1bf   : > { %399 = vst.msk [vmem:[%s170_s20 + $0x8] sm:$0xff] %vm320_vm0, %v395_v14 }
 0x1c0   : > { %vm389_vm4 = vcmp.ge.f32.partialorder %v385_v15, 0.0  ;;  %v393_v6 = vmul.f32 0.2, %v385_v15 }
 0x1c2   : > { %v397_v16 = vsel %vm389_vm4, %v385_v15, %v393_v6 }
 0x1c3   : > { %401 = vst.msk [vmem:[%s170_s20 + $0x18] sm:$0xff] %vm320_vm0, %v397_v16 }
 0x1c4 PF: > { %s13_s12 = sadd.s32 1, %s587_s12  }
 0x1c5   : > { %p10_p4 = scmp.ge.s32.totalorder %s13_s12, 4  }
 0x1c7   :  { %12 = sbr.rel (!%p10_p4) target bundleno = 1 (0x1), region = 62 }

// kernel: patchgan_discriminator.8
= control target key start
LH: loop header
LB: loop body
LE: loop exit
PB: predicated region body
PF: predicated region fallthrough
CT: control target
= control target key end

     0   :  { %s987_s12 = smov 0   ;;  %s1296_s0 = inlined_call_operand.vmem [shape: f32[64,512], index: 0, kind: input, shape index: {}]   ;;  %s1297_s1 = inlined_call_operand.vmem [shape: f32[64,1], index: 1, kind: input, shape index: {}]   ;;  %s1298_s2 = inlined_call_operand.vmem [shape: f32[2,512,9], index: 2, kind: input, shape index: {}]   ;;  %s1299_s3 = inlined_call_operand.vmem [shape: f32[2,64,9], index: 3, kind: output, shape index: {}]  }
   0x1 LB: > { %s742_s13 = sadd.s32 4294967295, %s964_s12   ;;  %p746_p0 = scmp.ge.s32.totalorder %s964_s12, 1  ;;  %s964_s12 = sphi %s987_s12, %s13_s12  }
   0x2   : > { %p137_p1 = scmp.lt.s32.totalorder %s964_s12, 3 }
   0x4   : > { %p138_p2 = pnand %p746_p0, %p137_p1 }
   0x5   : > { %p161_p3 = scmp.lt.s32.totalorder (!%p138_p2), %s742_s13, 1  ;;  %v172_v0 = vld [vmem:[%s1296_s0 + $0x8] sm:$0xff] (!%p138_p2)  ;;  %v174_v1 = vld [vmem:[%s1296_s0 + $0x18] sm:$0xff] (!%p138_p2)  ;;  %v966_v2 = vmov (!%p138_p2), 0   ;;  %vm525_vm0 = vcmask (!%p138_p2), 72704  }
   0x6   : > { %141 = sbr.rel (%p138_p2) target bundleno = 472 (0x1d8), region = 32  ;;  %379 = vmatprep.mubr.f32.mxu0 (!%p138_p2), %v172_v0  ;;  %484 = vmatprep.mubr.f32.mxu1 (!%p138_p2), %v174_v1 }
   0x7   : > { %940 = vset.pattern.permute.xlu0 (!%p138_p2), %v966_v2  ;;  %941 = vset.pattern.permute.xlu1 (!%p138_p2), %v966_v2 }
   0xd   : > { %s1301_s13 = smov (!%p161_p3, %s742_s13), 1 }
   0xe   : > { %s753_s18 = sshll.u32 %s1301_s13, 9  ;;  %s754_s23 = sshll.u32 %s1301_s13, 6 }
   0xf   : > { %s1007_s21 = scalar_lea.vmem %s1298_s2, %s753_s18  ;;  %s1258_s26 = scalar_lea.vmem %s1299_s3, %s754_s23 }
  0x10   : > { %v219_v3 = vld [vmem:[%s1007_s21 + $0x80] sm:$0xff]  ;;  %v220_v4 = vld [vmem:[%s1007_s21 + $0x88] sm:$0xff]  ;;  %v221_v14 = vld [vmem:[%s1007_s21 + $0x90] sm:$0xff] }
  0x11   : > { %v203_v5 = vld [vmem:[%s1007_s21] sm:$0xff]  ;;  %v867_v6 = vpack.c.bf16 %v220_v4, %v219_v3  ;;  %v204_v7 = vld [vmem:[%s1007_s21 + $0x8] sm:$0xff]  ;;  %v222_v16 = vld [vmem:[%s1007_s21 + $0x98] sm:$0xff] }
  0x12   : > { %v251_v8 = vld [vmem:[%s1007_s21 + $0x180] sm:$0xff]  ;;  %v252_v9 = vld [vmem:[%s1007_s21 + $0x188] sm:$0xff]  ;;  %v869_v10 = vpack.c.bf16 %v204_v7, %v203_v5  ;;  %v205_v17 = vld [vmem:[%s1007_s21 + $0x10] sm:$0xff]  ;;  %v871_v19 = vpack.c.bf16 %v222_v16, %v221_v14 }
  0x13   : > { %v899_v11 = vpack.c.bf16 %v252_v9, %v251_v8  ;;  %v235_v12 = vld [vmem:[%s1007_s21 + $0x100] sm:$0xff]  ;;  %v236_v13 = vld [vmem:[%s1007_s21 + $0x108] sm:$0xff]  ;;  %868 = vmatprep.subr.bf16.mxu0 %v867_v6  ;;  %v206_v18 = vld [vmem:[%s1007_s21 + $0x18] sm:$0xff] }
  0x14   : > { %v901_v15 = vpack.c.bf16 %v236_v13, %v235_v12  ;;  %870 = vmatpush3.bf16.msra.mxu0 %v869_v10  ;;  %v873_v20 = vpack.c.bf16 %v206_v18, %v205_v17  ;;  %v253_v21 = vld [vmem:[%s1007_s21 + $0x190] sm:$0xff]  ;;  %v254_v22 = vld [vmem:[%s1007_s21 + $0x198] sm:$0xff]  ;;  %v223_v26 = vld [vmem:[%s1007_s21 + $0xa0] sm:$0xff] }
  0x15   : > { %900 = vmatprep.subr.bf16.mxu1 %v899_v11  ;;  %v237_v23 = vld [vmem:[%s1007_s21 + $0x110] sm:$0xff]  ;;  %v903_v24 = vpack.c.bf16 %v254_v22, %v253_v21  ;;  %v238_v25 = vld [vmem:[%s1007_s21 + $0x118] sm:$0xff]  ;;  %v224_v27 = vld [vmem:[%s1007_s21 + $0xa8] sm:$0xff]  ;;  %872 = vmatprep.subr.bf16.mxu0 %v871_v19 }
  0x16   : > { %902 = vmatpush3.bf16.msra.mxu1 %v901_v15  ;;  %v905_v28 = vpack.c.bf16 %v238_v25, %v237_v23  ;;  %v875_v29 = vpack.c.bf16 %v224_v27, %v223_v26  ;;  %v207_v30 = vld [vmem:[%s1007_s21 + $0x20] sm:$0xff]  ;;  %v208_v31 = vld [vmem:[%s1007_s21 + $0x28] sm:$0xff]  ;;  %v225_v38 = vld [vmem:[%s1007_s21 + $0xb0] sm:$0xff] }
  0x17   : > { %v255_v32 = vld [vmem:[%s1007_s21 + $0x1a0] sm:$0xff]  ;;  %904 = vmatprep.subr.bf16.mxu1 %v903_v24  ;;  %v256_v33 = vld [vmem:[%s1007_s21 + $0x1a8] sm:$0xff]  ;;  %v877_v36 = vpack.c.bf16 %v208_v31, %v207_v30  ;;  %v226_v39 = vld [vmem:[%s1007_s21 + $0xb8] sm:$0xff] }
  0x18   : > { %v239_v34 = vld [vmem:[%s1007_s21 + $0x120] sm:$0xff]  ;;  %v240_v35 = vld [vmem:[%s1007_s21 + $0x128] sm:$0xff]  ;;  %874 = vmatpush3.bf16.msra.mxu0 %v873_v20  ;;  %v907_v37 = vpack.c.bf16 %v256_v33, %v255_v32  ;;  %v209_v40 = vld [vmem:[%s1007_s21 + $0x30] sm:$0xff]  ;;  %v879_v42 = vpack.c.bf16 %v226_v39, %v225_v38 }
  0x19   : > { %876 = vmatprep.subr.bf16.mxu0 %v875_v29  ;;  %v909_v41 = vpack.c.bf16 %v240_v35, %v239_v34  ;;  %v210_v43 = vld [vmem:[%s1007_s21 + $0x38] sm:$0xff]  ;;  %v257_v44 = vld [vmem:[%s1007_s21 + $0x1b0] sm:$0xff]  ;;  %v227_v49 = vld [vmem:[%s1007_s21 + $0xc0] sm:$0xff] }
  0x1a   : > { %906 = vmatpush3.bf16.msra.mxu1 %v905_v28  ;;  %v258_v45 = vld [vmem:[%s1007_s21 + $0x1b8] sm:$0xff]  ;;  %v241_v47 = vld [vmem:[%s1007_s21 + $0x130] sm:$0xff]  ;;  %v228_v50 = vld [vmem:[%s1007_s21 + $0xc8] sm:$0xff]  ;;  %v881_v51 = vpack.c.bf16 %v210_v43, %v209_v40 }
  0x1b   : > { %908 = vmatprep.subr.bf16.mxu1 %v907_v37  ;;  %v911_v46 = vpack.c.bf16 %v258_v45, %v257_v44  ;;  %v242_v48 = vld [vmem:[%s1007_s21 + $0x138] sm:$0xff]  ;;  %v259_v52 = vld [vmem:[%s1007_s21 + $0x1c0] sm:$0xff]  ;;  %v260_v53 = vld [vmem:[%s1007_s21 + $0x1c8] sm:$0xff]  ;;  %v883_v55 = vpack.c.bf16 %v228_v50, %v227_v49 }
  0x1c   : > { %878 = vmatpush3.bf16.msra.mxu0 %v877_v36  ;;  %v913_v54 = vpack.c.bf16 %v242_v48, %v241_v47  ;;  %v211_v56 = vld [vmem:[%s1007_s21 + $0x40] sm:$0xff]  ;;  %v212_v57 = vld [vmem:[%s1007_s21 + $0x48] sm:$0xff]  ;;  %v915_v59 = vpack.c.bf16 %v260_v53, %v259_v52  ;;  %v229_v61 = vld [vmem:[%s1007_s21 + $0xd0] sm:$0xff] }
  0x1d   : > { %880 = vmatprep.subr.bf16.mxu0 %v879_v42  ;;  %v243_v58 = vld [vmem:[%s1007_s21 + $0x140] sm:$0xff]  ;;  %v244_v60 = vld [vmem:[%s1007_s21 + $0x148] sm:$0xff]  ;;  %v230_v62 = vld [vmem:[%s1007_s21 + $0xd8] sm:$0xff]  ;;  %v885_v1 = vpack.c.bf16 %v212_v57, %v211_v56 }
  0x1e   : > { %910 = vmatpush3.bf16.msra.mxu1 %v909_v41  ;;  %v261_v63 = vld [vmem:[%s1007_s21 + $0x1d0] sm:$0xff]  ;;  %v262_v0 = vld [vmem:[%s1007_s21 + $0x1d8] sm:$0xff]  ;;  %v917_v2 = vpack.c.bf16 %v244_v60, %v243_v58  ;;  %v887_v3 = vpack.c.bf16 %v230_v62, %v229_v61  ;;  %v231_v9 = vld [vmem:[%s1007_s21 + $0xe0] sm:$0xff] }
  0x1f   : > { %912 = vmatprep.subr.bf16.mxu1 %v911_v46  ;;  %v213_v4 = vld [vmem:[%s1007_s21 + $0x50] sm:$0xff]  ;;  %v214_v5 = vld [vmem:[%s1007_s21 + $0x58] sm:$0xff]  ;;  %v919_v7 = vpack.c.bf16 %v262_v0, %v261_v63  ;;  %v232_v10 = vld [vmem:[%s1007_s21 + $0xe8] sm:$0xff] }
  0x20   : > { %882 = vmatpush3.bf16.msra.mxu0 %v881_v51  ;;  %v245_v6 = vld [vmem:[%s1007_s21 + $0x150] sm:$0xff]  ;;  %v246_v8 = vld [vmem:[%s1007_s21 + $0x158] sm:$0xff]  ;;  %v263_v11 = vld [vmem:[%s1007_s21 + $0x1e0] sm:$0xff]  ;;  %v889_v13 = vpack.c.bf16 %v214_v5, %v213_v4  ;;  %v891_v15 = vpack.c.bf16 %v232_v10, %v231_v9 }
  0x21   : > { %884 = vmatprep.subr.bf16.mxu0 %v883_v55  ;;  %v264_v12 = vld [vmem:[%s1007_s21 + $0x1e8] sm:$0xff]  ;;  %v921_v14 = vpack.c.bf16 %v246_v8, %v245_v6  ;;  %v215_v16 = vld [vmem:[%s1007_s21 + $0x60] sm:$0xff]  ;;  %v233_v21 = vld [vmem:[%s1007_s21 + $0xf0] sm:$0xff] }
  0x22   : > { %914 = vmatpush3.bf16.msra.mxu1 %v913_v54  ;;  %v216_v17 = vld [vmem:[%s1007_s21 + $0x68] sm:$0xff]  ;;  %v247_v18 = vld [vmem:[%s1007_s21 + $0x160] sm:$0xff]  ;;  %v923_v19 = vpack.c.bf16 %v264_v12, %v263_v11  ;;  %v234_v22 = vld [vmem:[%s1007_s21 + $0xf8] sm:$0xff] }
  0x23   : > { %916 = vmatprep.subr.bf16.mxu1 %v915_v59  ;;  %v248_v20 = vld [vmem:[%s1007_s21 + $0x168] sm:$0xff]  ;;  %v265_v23 = vld [vmem:[%s1007_s21 + $0x1f0] sm:$0xff]  ;;  %v266_v24 = vld [vmem:[%s1007_s21 + $0x1f8] sm:$0xff]  ;;  %v893_v25 = vpack.c.bf16 %v216_v17, %v215_v16  ;;  %v895_v27 = vpack.c.bf16 %v234_v22, %v233_v21 }
  0x24   : > { %886 = vmatpush3.bf16.msra.mxu0 %v885_v1  ;;  %v925_v26 = vpack.c.bf16 %v248_v20, %v247_v18  ;;  %v217_v28 = vld [vmem:[%s1007_s21 + $0x70] sm:$0xff]  ;;  %v218_v29 = vld [vmem:[%s1007_s21 + $0x78] sm:$0xff]  ;;  %v927_v30 = vpack.c.bf16 %v266_v24, %v265_v23  ;;  %v267_v33 = vld [vmem:[%s1297_s1] sm:$0xff] }
  0x25   : > { %888 = vmatprep.subr.bf16.mxu0 %v887_v3  ;;  %v249_v31 = vld [vmem:[%s1007_s21 + $0x170] sm:$0xff]  ;;  %v250_v32 = vld [vmem:[%s1007_s21 + $0x178] sm:$0xff]  ;;  %277 = vperm.xlu0 %940, %v267_v33   ;;  %v897_v35 = vpack.c.bf16 %v218_v29, %v217_v28  ;;  %v268_v36 = vld [vmem:[%s1297_s1 + $0x8] sm:$0xff] }
  0x26   : > { %918 = vmatpush3.bf16.msra.mxu1 %v917_v2  ;;  %v269_v34 = vld [vmem:[%s1297_s1 + $0x10] sm:$0xff]  ;;  %v929_v37 = vpack.c.bf16 %v250_v32, %v249_v31  ;;  %v270_v38 = vld [vmem:[%s1297_s1 + $0x18] sm:$0xff]  ;;  %v171_v39 = vld [vmem:[%s1296_s0] sm:$0xff] }
  0x27   : > { %920 = vmatprep.subr.bf16.mxu1 %v919_v7  ;;  %287 = vperm.xlu1 %941, %v269_v34   ;;  %v271_v40 = vld [vmem:[%s1297_s1 + $0x20] sm:$0xff]  ;;  %v173_v41 = vld [vmem:[%s1296_s0 + $0x10] sm:$0xff]  ;;  %v176_v42 = vld [vmem:[%s1296_s0 + $0x28] sm:$0xff] }
  0x28   : > { %890 = vmatpush3.bf16.msra.mxu0 %v889_v13  ;;  %v178_v43 = vld [vmem:[%s1296_s0 + $0x38] sm:$0xff]  ;;  %v272_v44 = vld [vmem:[%s1297_s1 + $0x28] sm:$0xff]  ;;  %v175_v45 = vld [vmem:[%s1296_s0 + $0x20] sm:$0xff] }
  0x29   : > { %892 = vmatprep.subr.bf16.mxu0 %v891_v15  ;;  %282 = vperm.xlu0 %940, %v268_v36   ;;  %v273_v46 = vld [vmem:[%s1297_s1 + $0x30] sm:$0xff]  ;;  %v180_v48 = vld [vmem:[%s1296_s0 + $0x48] sm:$0xff]  ;;  %v182_v49 = vld [vmem:[%s1296_s0 + $0x58] sm:$0xff] }
  0x2a   : > { %922 = vmatpush3.bf16.msra.mxu1 %v921_v14  ;;  %v177_v47 = vld [vmem:[%s1296_s0 + $0x30] sm:$0xff]  ;;  %v274_v50 = vld [vmem:[%s1297_s1 + $0x38] sm:$0xff]  ;;  %v179_v51 = vld [vmem:[%s1296_s0 + $0x40] sm:$0xff] }
  0x2b   : > { %924 = vmatprep.subr.bf16.mxu1 %v923_v19  ;;  %292 = vperm.xlu1 %941, %v270_v38   ;;  %v181_v52 = vld [vmem:[%s1296_s0 + $0x50] sm:$0xff]  ;;  %v184_v53 = vld [vmem:[%s1296_s0 + $0x68] sm:$0xff]  ;;  %v186_v54 = vld [vmem:[%s1296_s0 + $0x78] sm:$0xff] }
  0x2c   : > { %894 = vmatpush3.bf16.msra.mxu0 %v893_v25  ;;  %v183_v55 = vld [vmem:[%s1296_s0 + $0x60] sm:$0xff]  ;;  %v185_v56 = vld [vmem:[%s1296_s0 + $0x70] sm:$0xff]  ;;  %v188_v57 = vld [vmem:[%s1296_s0 + $0x88] sm:$0xff] }
  0x2d   : > { %896 = vmatprep.subr.bf16.mxu0 %v895_v27  ;;  %297 = vperm.xlu0 %940, %v271_v40   ;;  %v190_v58 = vld [vmem:[%s1296_s0 + $0x98] sm:$0xff]  ;;  %v187_v59 = vld [vmem:[%s1296_s0 + $0x80] sm:$0xff]  ;;  %v189_v60 = vld [vmem:[%s1296_s0 + $0x90] sm:$0xff] }
  0x2e   : > { %926 = vmatpush3.bf16.msra.mxu1 %v925_v26  ;;  %v192_v61 = vld [vmem:[%s1296_s0 + $0xa8] sm:$0xff]  ;;  %v194_v62 = vld [vmem:[%s1296_s0 + $0xb8] sm:$0xff]  ;;  %v191_v63 = vld [vmem:[%s1296_s0 + $0xa0] sm:$0xff] }
  0x2f   : > { %928 = vmatprep.subr.bf16.mxu1 %v927_v30  ;;  %302 = vperm.xlu1 %941, %v272_v44   ;;  %v193_v0 = vld [vmem:[%s1296_s0 + $0xb0] sm:$0xff]  ;;  %v196_v1 = vld [vmem:[%s1296_s0 + $0xc8] sm:$0xff]  ;;  %v198_v2 = vld [vmem:[%s1296_s0 + $0xd8] sm:$0xff] }
  0x30   : > { %898 = vmatpush3.bf16.msra.mxu0 %v897_v35  ;;  %v195_v3 = vld [vmem:[%s1296_s0 + $0xc0] sm:$0xff]  ;;  %v197_v4 = vld [vmem:[%s1296_s0 + $0xd0] sm:$0xff]  ;;  %v200_v5 = vld [vmem:[%s1296_s0 + $0xe8] sm:$0xff] }
  0x31   : > { %307 = vperm.xlu0 %940, %v273_v46   ;;  %v202_v6 = vld [vmem:[%s1296_s0 + $0xf8] sm:$0xff]  ;;  %v199_v7 = vld [vmem:[%s1296_s0 + $0xe0] sm:$0xff]  ;;  %v201_v8 = vld [vmem:[%s1296_s0 + $0xf0] sm:$0xff] }
  0x32   : > { %930 = vmatpush3.bf16.msra.mxu1 %v929_v37 }
  0x33   : > { %380 = vmatmul.mubr.f32.vlgmr.msra.gmra.mrb[0].mxu0 %v171_v39  ;;  %312 = vperm.xlu1 %941, %v274_v50  }
  0x34   : > { %384 = vmatprep.mubr.f32.mxu0 %v176_v42 }
  0x35   : > { %485 = vmatmul.mubr.f32.vlgmr.msra.gmra.mrb[0].mxu1 %v173_v41 }
  0x36   : > { %489 = vmatprep.mubr.f32.mxu1 %v178_v43 }
  0x37   : > { %385 = vmatmul.mubr.f32.gmra.mrb[2].mxu0 %v175_v45 }
  0x38   : > { %389 = vmatprep.mubr.f32.mxu0 %v180_v48 }
  0x39   : > { %490 = vmatmul.mubr.f32.gmra.mrb[2].mxu1 %v177_v47 }
  0x3a   : > { %494 = vmatprep.mubr.f32.mxu1 %v182_v49 }
  0x3b   : > { %390 = vmatmul.mubr.f32.gmra.mrb[4].mxu0 %v179_v51 }
  0x3c   : > { %394 = vmatprep.mubr.f32.mxu0 %v184_v53 }
  0x3d   : > { %495 = vmatmul.mubr.f32.gmra.mrb[4].mxu1 %v181_v52 }
  0x3e   : > { %499 = vmatprep.mubr.f32.mxu1 %v186_v54 }
  0x3f   : > { %395 = vmatmul.mubr.f32.gmra.mrb[6].mxu0 %v183_v55 }
  0x40   : > { %399 = vmatprep.mubr.f32.mxu0 %v188_v57 }
  0x41   : > { %500 = vmatmul.mubr.f32.gmra.mrb[6].mxu1 %v185_v56 }
  0x42   : > { %504 = vmatprep.mubr.f32.mxu1 %v190_v58 }
  0x43   : > { %400 = vmatmul.mubr.f32.gmra.mrb[8].mxu0 %v187_v59 }
  0x44   : > { %404 = vmatprep.mubr.f32.mxu0 %v192_v61 }
  0x45   : > { %505 = vmatmul.mubr.f32.gmra.mrb[8].mxu1 %v189_v60 }
  0x46   : > { %509 = vmatprep.mubr.f32.mxu1 %v194_v62 }
  0x47   : > { %405 = vmatmul.mubr.f32.gmra.mrb[10].mxu0 %v191_v63 }
  0x48   : > { %409 = vmatprep.mubr.f32.mxu0 %v196_v1 }
  0x49   : > { %510 = vmatmul.mubr.f32.gmra.mrb[10].mxu1 %v193_v0 }
  0x4a   : > { %514 = vmatprep.mubr.f32.mxu1 %v198_v2 }
  0x4b   : > { %410 = vmatmul.mubr.f32.gmra.mrb[12].mxu0 %v195_v3 }
  0x4c   : > { %414 = vmatprep.mubr.f32.mxu0 %v200_v5 }
  0x4d   : > { %515 = vmatmul.mubr.f32.gmra.mrb[12].mxu1 %v197_v4 }
  0x4e   : > { %519 = vmatprep.mubr.f32.mxu1 %v202_v6 }
  0x4f   : > { %415 = vmatmul.mubr.f32.gmra.mrb[14].mxu0 %v199_v7 }
  0x51   : > { %520 = vmatmul.mubr.f32.gmra.mrb[14].mxu1 %v201_v8 }
  0xa4   : > { %v278_v9 = vpop.permute.xlu0 %277 }
  0xa6   : > { %v288_v25 = vpop.permute.xlu1 %287 }
  0xa8   : > { %v283_v23 = vpop.permute.xlu0 %282 }
  0xaa   : > { %v293_v47 = vpop.permute.xlu1 %292 }
  0xac   : > { %v298_v59 = vpop.permute.xlu0 %297 }
  0xae   : > { %v303_v6 = vpop.permute.xlu1 %302 }
 0x106   : > { %v787_v10 = vpop.f32.mrb[0].mxu0 }
 0x107   : > { %v788_v11 = vpop.f32.mrb[1].mxu0 }
 0x108   : > { %v843_v12 = vpop.f32.mrb[0].mxu1  ;;  %v789_v13 = vadd.f32 %v788_v11, %v787_v10 }
 0x109   : > { %v844_v14 = vpop.f32.mrb[1].mxu1 }
 0x10a   : > { %v845_v15 = vadd.f32 %v844_v14, %v843_v12  ;;  %v382_v16 = vadd.f32 %v789_v13, %v278_v9  ;;  %v790_v17 = vpop.f32.mrb[2].mxu0 }
 0x10b   : > { %v791_v18 = vpop.f32.mrb[3].mxu0 }
 0x10c   : > { %v846_v19 = vpop.f32.mrb[2].mxu1  ;;  %v1187_v20 = vadd.f32 %v845_v15, %v382_v16  ;;  %v792_v21 = vadd.f32 %v791_v18, %v790_v17  ;;  %v308_v18 = vpop.permute.xlu0 %307 }
 0x10d   : > { %v847_v22 = vpop.f32.mrb[3].mxu1 }
 0x10e   : > { %v848_v24 = vadd.f32 %v847_v22, %v846_v19  ;;  %v387_v26 = vadd.f32 %v792_v21, %v283_v23  ;;  %v793_v27 = vpop.f32.mrb[4].mxu0  ;;  %v526_v28 = vsel %vm525_vm0, %v1187_v20, 0.0  ;;  %v559_v29 = vmul.f32 %v1187_v20, %v1187_v20 }
 0x10f   : > { %527 = vadd.xlane.f32.xlu0 %v526_v28  ;;  %v794_v30 = vpop.f32.mrb[5].mxu0 }
 0x110   : > { %v849_v31 = vpop.f32.mrb[4].mxu1  ;;  %v1193_v32 = vadd.f32 %v848_v24, %v387_v26  ;;  %v795_v33 = vadd.f32 %v794_v30, %v793_v27  ;;  %v567_v34 = vsel %vm525_vm0, %v559_v29, 0.0 }
 0x111   : > { %v850_v35 = vpop.f32.mrb[5].mxu1  ;;  %568 = vadd.xlane.f32.xlu1 %v567_v34 }
 0x112   : > { %v851_v36 = vadd.f32 %v850_v35, %v849_v31  ;;  %v392_v37 = vadd.f32 %v795_v33, %v288_v25  ;;  %v796_v38 = vpop.f32.mrb[6].mxu0  ;;  %v560_v39 = vmul.f32 %v1193_v32, %v1193_v32  ;;  %v529_v45 = vsel %vm525_vm0, %v1193_v32, 0.0  ;;  %v313_v31 = vpop.permute.xlu1 %312 }
 0x113   : > { %v797_v40 = vpop.f32.mrb[7].mxu0 }
 0x114   : > { %v852_v41 = vpop.f32.mrb[6].mxu1  ;;  %v1198_v42 = vadd.f32 %v851_v36, %v392_v37  ;;  %v798_v43 = vadd.f32 %v797_v40, %v796_v38  ;;  %v570_v46 = vsel %vm525_vm0, %v560_v39, 0.0 }
 0x115   : > { %v853_v44 = vpop.f32.mrb[7].mxu1  ;;  %530 = vadd.xlane.f32.xlu1 %v529_v45  ;;  %571 = vadd.xlane.f32.xlu0 %v570_v46 }
 0x116   : > { %v854_v48 = vadd.f32 %v853_v44, %v852_v41  ;;  %v397_v49 = vadd.f32 %v798_v43, %v293_v47  ;;  %v799_v50 = vpop.f32.mrb[8].mxu0  ;;  %v532_v51 = vsel %vm525_vm0, %v1198_v42, 0.0  ;;  %v561_v52 = vmul.f32 %v1198_v42, %v1198_v42 }
 0x117   : > { %v800_v53 = vpop.f32.mrb[9].mxu0 }
 0x118   : > { %v855_v54 = vpop.f32.mrb[8].mxu1  ;;  %v1207_v55 = vadd.f32 %v854_v48, %v397_v49  ;;  %v801_v56 = vadd.f32 %v800_v53, %v799_v50  ;;  %v573_v58 = vsel %vm525_vm0, %v561_v52, 0.0 }
 0x119   : > { %v856_v57 = vpop.f32.mrb[9].mxu1  ;;  %533 = vadd.xlane.f32.xlu0 %v532_v51  ;;  %574 = vadd.xlane.f32.xlu1 %v573_v58 }
 0x11a   : > { %v857_v60 = vadd.f32 %v856_v57, %v855_v54  ;;  %v402_v61 = vadd.f32 %v801_v56, %v298_v59  ;;  %v802_v62 = vpop.f32.mrb[10].mxu0  ;;  %v535_v4 = vsel %vm525_vm0, %v1207_v55, 0.0  ;;  %v562_v5 = vmul.f32 %v1207_v55, %v1207_v55 }
 0x11b   : > { %v803_v63 = vpop.f32.mrb[11].mxu0 }
 0x11c   : > { %v858_v0 = vpop.f32.mrb[10].mxu1  ;;  %v1210_v1 = vadd.f32 %v857_v60, %v402_v61  ;;  %v804_v2 = vadd.f32 %v803_v63, %v802_v62  ;;  %v576_v17 = vsel %vm525_vm0, %v562_v5, 0.0 }
 0x11d   : > { %v859_v3 = vpop.f32.mrb[11].mxu1  ;;  %536 = vadd.xlane.f32.xlu0 %v535_v4 }
 0x11e   : > { %v860_v7 = vadd.f32 %v859_v3, %v858_v0  ;;  %v407_v8 = vadd.f32 %v804_v2, %v303_v6  ;;  %v805_v9 = vpop.f32.mrb[12].mxu0  ;;  %v538_v10 = vsel %vm525_vm0, %v1210_v1, 0.0  ;;  %v563_v11 = vmul.f32 %v1210_v1, %v1210_v1 }
 0x11f   : > { %v806_v12 = vpop.f32.mrb[13].mxu0  ;;  %539 = vadd.xlane.f32.xlu1 %v538_v10 }
 0x120   : > { %v861_v13 = vpop.f32.mrb[12].mxu1  ;;  %v1220_v14 = vadd.f32 %v860_v7, %v407_v8  ;;  %v807_v15 = vadd.f32 %v806_v12, %v805_v9  ;;  %v579_v23 = vsel %vm525_vm0, %v563_v11, 0.0 }
 0x121   : > { %v862_v16 = vpop.f32.mrb[13].mxu1  ;;  %577 = vadd.xlane.f32.xlu0 %v576_v17 }
 0x122   : > { %v863_v19 = vadd.f32 %v862_v16, %v861_v13  ;;  %v412_v21 = vadd.f32 %v807_v15, %v308_v18  ;;  %v808_v22 = vpop.f32.mrb[14].mxu0  ;;  %v541_v29 = vsel %vm525_vm0, %v1220_v14, 0.0  ;;  %v564_v30 = vmul.f32 %v1220_v14, %v1220_v14 }
 0x123   : > { %v809_v24 = vpop.f32.mrb[15].mxu0  ;;  %580 = vadd.xlane.f32.xlu1 %v579_v23 }
 0x124   : > { %v864_v25 = vpop.f32.mrb[14].mxu1  ;;  %v1224_v26 = vadd.f32 %v863_v19, %v412_v21  ;;  %v810_v27 = vadd.f32 %v809_v24, %v808_v22  ;;  %v582_v38 = vsel %vm525_vm0, %v564_v30, 0.0 }
 0x125   : > { %v865_v28 = vpop.f32.mrb[15].mxu1  ;;  %542 = vadd.xlane.f32.xlu0 %v541_v29 }
 0x126   : > { %v866_v33 = vadd.f32 %v865_v28, %v864_v25  ;;  %v417_v34 = vadd.f32 %v810_v27, %v313_v31  ;;  %v544_v35 = vsel %vm525_vm0, %v1224_v26, 0.0  ;;  %v565_v36 = vmul.f32 %v1224_v26, %v1224_v26 }
 0x127   : > { %545 = vadd.xlane.f32.xlu1 %v544_v35 }
 0x128   : > { %v1234_v37 = vadd.f32 %v866_v33, %v417_v34  ;;  %v585_v39 = vsel %vm525_vm0, %v565_v36, 0.0 }
 0x129   : > { %583 = vadd.xlane.f32.xlu0 %v582_v38 }
 0x12a   : > { %v547_v40 = vsel %vm525_vm0, %v1234_v37, 0.0  ;;  %v566_v41 = vmul.f32 %v1234_v37, %v1234_v37 }
 0x12b   : > { %586 = vadd.xlane.f32.xlu1 %v585_v39 }
 0x12c   : > { %v588_v43 = vsel %vm525_vm0, %v566_v41, 0.0 }
 0x12d   : > { %548 = vadd.xlane.f32.xlu0 %v547_v40 }
 0x131   : > { %589 = vadd.xlane.f32.xlu0 %v588_v43 }
 0x19c   : > { %v528_v44 = vpop.xlane.xlu0 %527 }
 0x19d   : > { %v551_v45 = vmul.f32 0.11111111, %v528_v44 }
 0x19e   : > { %v569_v46 = vpop.xlane.xlu1 %568 }
 0x19f   : > { %v599_v47 = vmul.f32 %v551_v45, %v551_v45  ;;  %v591_v48 = vmul.f32 0.11111111, %v569_v46  ;;  %v623_v13 = vsub.f32 %v1187_v20, %v551_v45 }
 0x1a1   : > { %v607_v49 = vsub.f32 %v591_v48, %v599_v47 }
 0x1a2   : > { %v531_v50 = vpop.xlane.xlu1 %530  ;;  %v572_v51 = vpop.xlane.xlu0 %571 }
 0x1a3   : > { %v615_v52 = vmax.f32 %v607_v49, 0.0  ;;  %v552_v53 = vmul.f32 0.11111111, %v531_v50  ;;  %v592_v57 = vmul.f32 0.11111111, %v572_v51 }
 0x1a5   : > { %v631_v54 = vadd.f32 1e-05, %v615_v52  ;;  %v600_v56 = vmul.f32 %v552_v53, %v552_v53  ;;  %v624_v31 = vsub.f32 %v1193_v32, %v552_v53 }
 0x1a6   : > { %v534_v58 = vpop.xlane.xlu0 %533  ;;  %v575_v59 = vpop.xlane.xlu1 %574 }
 0x1a7   : > { %942 = vrsqrt.f32 %v631_v54  ;;  %v608_v60 = vsub.f32 %v592_v57, %v600_v56  ;;  %v553_v61 = vmul.f32 0.11111111, %v534_v58  ;;  %v593_v62 = vmul.f32 0.11111111, %v575_v59 }
 0x1a9   : > { %v616_v63 = vmax.f32 %v608_v60, 0.0  ;;  %v601_v0 = vmul.f32 %v553_v61, %v553_v61  ;;  %v625_v46 = vsub.f32 %v1198_v42, %v553_v61 }
 0x1aa   : > { %v537_v2 = vpop.xlane.xlu0 %536 }
 0x1ab   : > { %v632_v3 = vadd.f32 1e-05, %v616_v63  ;;  %v609_v4 = vsub.f32 %v593_v62, %v601_v0  ;;  %v1243_v5 = vmul.f32 0.11111111, %v537_v2 }
 0x1ac   : > { %v540_v6 = vpop.xlane.xlu1 %539 }
 0x1ad   : > { %944 = vrsqrt.f32 %v632_v3  ;;  %v617_v7 = vmax.f32 %v609_v4, 0.0  ;;  %v1245_v8 = vmul.f32 0.11111111, %v540_v6  ;;  %v602_v11 = vmul.f32 %v1243_v5, %v1243_v5 }
 0x1ae   : > { %v578_v9 = vpop.xlane.xlu0 %577  ;;  %v626_v61 = vsub.f32 %v1207_v55, %v1243_v5 }
 0x1af   : > { %v633_v10 = vadd.f32 1e-05, %v617_v7  ;;  %v594_v12 = vmul.f32 0.11111111, %v578_v9  ;;  %v603_v17 = vmul.f32 %v1245_v8, %v1245_v8  ;;  %v627_v2 = vsub.f32 %v1210_v1, %v1245_v8 }
 0x1b0   : > { %v581_v15 = vpop.xlane.xlu1 %580 }
 0x1b1   : > { %v943_v16 = vpop.eup %942  ;;  %946 = vrsqrt.f32 %v633_v10  ;;  %v610_v18 = vsub.f32 %v594_v12, %v602_v11  ;;  %v595_v19 = vmul.f32 0.11111111, %v581_v15 }
 0x1b2   : > { %v647_v21 = vmul.f32 %v943_v16, %v623_v13  ;;  %v543_v22 = vpop.xlane.xlu0 %542 }
 0x1b3   : > { %v618_v23 = vmax.f32 %v610_v18, 0.0  ;;  %v611_v24 = vsub.f32 %v595_v19, %v603_v17  ;;  %v1253_v25 = vmul.f32 0.11111111, %v543_v22 }
 0x1b4   : > { %vm655_vm1 = vcmp.ge.f32.partialorder %v647_v21, 0.0  ;;  %v663_v20 = vmul.f32 0.2, %v647_v21  ;;  %v546_v27 = vpop.xlane.xlu1 %545 }
 0x1b5   : > { %v634_v28 = vadd.f32 1e-05, %v618_v23  ;;  %v619_v29 = vmax.f32 %v611_v24, 0.0  ;;  %v1261_v33 = vmul.f32 0.11111111, %v546_v27  ;;  %v604_v38 = vmul.f32 %v1253_v25, %v1253_v25 }
 0x1b6   : > { %v671_v30 = vsel %vm655_vm1, %v647_v21, %v663_v20  ;;  %v584_v34 = vpop.xlane.xlu0 %583  ;;  %v628_v12 = vsub.f32 %v1220_v14, %v1253_v25 }
 0x1b7   : > { %v945_v35 = vpop.eup %944  ;;  %679 = vst.msk [vmem:[%s1258_s26] sm:$0xff] %vm525_vm0, %v671_v30  ;;  %948 = vrsqrt.f32 %v634_v28  ;;  %v635_v36 = vadd.f32 1e-05, %v619_v29  ;;  %v596_v39 = vmul.f32 0.11111111, %v584_v34  ;;  %v605_v43 = vmul.f32 %v1261_v33, %v1261_v33 }
 0x1b8   : > { %v648_v40 = vmul.f32 %v945_v35, %v624_v31  ;;  %v587_v41 = vpop.xlane.xlu1 %586  ;;  %v629_v8 = vsub.f32 %v1224_v26, %v1261_v33 }
 0x1b9   : > { %950 = vrsqrt.f32 %v635_v36  ;;  %v612_v32 = vsub.f32 %v596_v39, %v604_v38  ;;  %v597_v44 = vmul.f32 0.11111111, %v587_v41 }
 0x1ba   : > { %vm656_vm2 = vcmp.ge.f32.partialorder %v648_v40, 0.0  ;;  %v664_v45 = vmul.f32 0.2, %v648_v40  ;;  %v549_v47 = vpop.xlane.xlu0 %548 }
 0x1bb   : > { %v947_v48 = vpop.eup %946  ;;  %v620_v49 = vmax.f32 %v612_v32, 0.0  ;;  %v613_v50 = vsub.f32 %v597_v44, %v605_v43  ;;  %v558_v51 = vmul.f32 0.11111111, %v549_v47 }
 0x1bc   : > { %v672_v52 = vsel %vm656_vm2, %v648_v40, %v664_v45  ;;  %v649_v53 = vmul.f32 %v947_v48, %v625_v46 }
 0x1bd   : > { %680 = vst.msk [vmem:[%s1258_s26 + $0x8] sm:$0xff] %vm525_vm0, %v672_v52  ;;  %v636_v54 = vadd.f32 1e-05, %v620_v49  ;;  %v621_v56 = vmax.f32 %v613_v50, 0.0  ;;  %v606_v60 = vmul.f32 %v558_v51, %v558_v51  ;;  %v630_v14 = vsub.f32 %v1234_v37, %v558_v51 }
 0x1be   : > { %vm657_vm3 = vcmp.ge.f32.partialorder %v649_v53, 0.0  ;;  %v665_v57 = vmul.f32 0.2, %v649_v53  ;;  %v590_v58 = vpop.xlane.xlu0 %589 }
 0x1bf   : > { %952 = vrsqrt.f32 %v636_v54  ;;  %v637_v59 = vadd.f32 1e-05, %v621_v56  ;;  %v598_v62 = vmul.f32 0.11111111, %v590_v58 }
 0x1c0   : > { %v673_v42 = vsel %vm657_vm3, %v649_v53, %v665_v57 }
 0x1c1   : > { %v949_v63 = vpop.eup %948  ;;  %681 = vst.msk [vmem:[%s1258_s26 + $0x10] sm:$0xff] %vm525_vm0, %v673_v42  ;;  %954 = vrsqrt.f32 %v637_v59  ;;  %v614_v0 = vsub.f32 %v598_v62, %v606_v60 }
 0x1c2   : > { %v650_v3 = vmul.f32 %v949_v63, %v626_v61 }
 0x1c3   : > { %v951_v4 = vpop.eup %950  ;;  %v622_v6 = vmax.f32 %v614_v0, 0.0 }
 0x1c4   : > { %vm658_vm4 = vcmp.ge.f32.partialorder %v650_v3, 0.0  ;;  %v666_v7 = vmul.f32 0.2, %v650_v3  ;;  %v651_v9 = vmul.f32 %v951_v4, %v627_v2 }
 0x1c5   : > { %v638_v10 = vadd.f32 1e-05, %v622_v6 }
 0x1c6   : > { %v674_v11 = vsel %vm658_vm4, %v650_v3, %v666_v7  ;;  %vm659_vm5 = vcmp.ge.f32.partialorder %v651_v9, 0.0  ;;  %v667_v55 = vmul.f32 0.2, %v651_v9 }
 0x1c7   : > { %682 = vst.msk [vmem:[%s1258_s26 + $0x18] sm:$0xff] %vm525_vm0, %v674_v11  ;;  %956 = vrsqrt.f32 %v638_v10 }
 0x1c8   : > { %v675_v5 = vsel %vm659_vm5, %v651_v9, %v667_v55 }
 0x1c9   : > { %v953_v1 = vpop.eup %952  ;;  %683 = vst.msk [vmem:[%s1258_s26 + $0x20] sm:$0xff] %vm525_vm0, %v675_v5 }
 0x1ca   : > { %v652_v13 = vmul.f32 %v953_v1, %v628_v12 }
 0x1cb   : > { %v955_v15 = vpop.eup %954 }
 0x1cc   : > { %vm660_vm6 = vcmp.ge.f32.partialorder %v652_v13, 0.0  ;;  %v668_v16 = vmul.f32 0.2, %v652_v13  ;;  %v653_v17 = vmul.f32 %v955_v15, %v629_v8 }
 0x1ce   : > { %v676_v18 = vsel %vm660_vm6, %v652_v13, %v668_v16  ;;  %vm661_vm7 = vcmp.ge.f32.partialorder %v653_v17, 0.0  ;;  %v669_v19 = vmul.f32 0.2, %v653_v17 }
 0x1cf   : > { %684 = vst.msk [vmem:[%s1258_s26 + $0x28] sm:$0xff] %vm525_vm0, %v676_v18 }
 0x1d0   : > { %v677_v21 = vsel %vm661_vm7, %v653_v17, %v669_v19 }
 0x1d1   : > { %v957_v22 = vpop.eup %956  ;;  %685 = vst.msk [vmem:[%s1258_s26 + $0x30] sm:$0xff] %vm525_vm0, %v677_v21 }
 0x1d2   : > { %v654_v23 = vmul.f32 %v957_v22, %v630_v14 }
 0x1d4   : > { %vm662_vm8 = vcmp.ge.f32.partialorder %v654_v23, 0.0  ;;  %v670_v26 = vmul.f32 0.2, %v654_v23 }
 0x1d6   : > { %v678_v24 = vsel %vm662_vm8, %v654_v23, %v670_v26 }
 0x1d7   : > { %686 = vst.msk [vmem:[%s1258_s26 + $0x38] sm:$0xff] %vm525_vm0, %v678_v24 }
 0x1d8 PF: > { %s13_s12 = sadd.s32 1, %s964_s12  }
 0x1d9   : > { %p10_p4 = scmp.ge.s32.totalorder %s13_s12, 4  }
 0x1db   :  { %12 = sbr.rel (!%p10_p4) target bundleno = 1 (0x1), region = 62 }

// kernel: patchgan_discriminator.9
= control target key start
LH: loop header
LB: loop body
LE: loop exit
PB: predicated region body
PF: predicated region fallthrough
CT: control target
= control target key end

     0   :  { %s998_s14 = smov 0   ;;  %s1182_s0 = inlined_call_operand.vmem [shape: f32[1,1024], index: 0, kind: input, shape index: {}]   ;;  %s1183_s1 = inlined_call_operand.<no memory space> [shape: f32[1,1], index: 1, kind: input, shape index: {}]   ;;  %s1184_s2 = inlined_call_operand.vmem [shape: f32[2,1024,4], index: 2, kind: input, shape index: {}]   ;;  %s1185_s3 = inlined_call_operand.vmem [shape: f32[2,1,4], index: 3, kind: output, shape index: {}]  }
   0x1   :  { %v8_v0 = vstv %s1183_s1 }
   0x2   :  { %9 = vst [vmem:[#allocation2] sm:$0x1] %v8_v0 }
   0x3 LB: > { %s678_s15 = sadd.s32 4294967295, %s972_s14   ;;  %p682_p0 = scmp.ge.s32.totalorder %s972_s14, 1  ;;  %s972_s14 = sphi %s998_s14, %s15_s14  }
   0x4   : > { %p139_p1 = scmp.lt.s32.totalorder %s972_s14, 3 }
   0x6   : > { %p140_p2 = pnand %p682_p0, %p139_p1 }
   0x7   : > { %p161_p3 = scmp.lt.s32.totalorder (!%p140_p2), %s678_s15, 1  ;;  %v304_v1 = vlaneseq (!%p140_p2)  ;;  %v974_v3 = vmov (!%p140_p2), 0   ;;  %v1013_v5 = vld [vmem:[%s1182_s0] sm:$0xff] (!%p140_p2)  ;;  %vm629_vm0 = vcmask (!%p140_p2), 24576  }
   0x8   : > { %143 = sbr.rel (%p140_p2) target bundleno = 305 (0x131), region = 32  ;;  %965 = vset.pattern.permute.xlu0 (!%p140_p2), %v974_v3 }
   0x9   : > { %v298_v2 = vld [vmem:[#allocation2] sm:$0x1] (!%p140_p2)  ;;  %v1008_v4 = vshrl.u32 (!%p140_p2), %v304_v1, 7 }
   0xa   : > { %301 = vperm.xlu0 (!%p140_p2), %965, %v298_v2  }
   0xb   : > { %v315_v6 = vsub.s32 (!%p140_p2), 1, %v1008_v4  ;;  %v323_v7 = vsub.s32 (!%p140_p2), 3, %v1008_v4  ;;  %v327_v8 = vsub.s32 (!%p140_p2), 4, %v1008_v4  ;;  %v335_v9 = vsub.s32 (!%p140_p2), 6, %v1008_v4 }
   0xd   : > { %v316_v13 = vrot.slane (!%p140_p2), %v1013_v5, %v315_v6  ;;  %v324_v14 = vrot.slane (!%p140_p2), %v1013_v5, %v323_v7  ;;  %v1034_v19 = vrot.slane (!%p140_p2), %v1013_v5, %v327_v8  ;;  %v1040_v25 = vrot.slane (!%p140_p2), %v1013_v5, %v335_v9 }
   0xf   : > { %s1187_s15 = smov (!%p161_p3, %s678_s15), 1  ;;  %413 = vmatprep.mubr.f32.mxu0 %v316_v13  ;;  %483 = vmatprep.mubr.f32.mxu1 %v324_v14 }
  0x10   : > { %s687_s17 = sshll.u32 %s1187_s15, 10  ;;  %s168_s23 = scalar_lea.vmem %s1185_s3, %s1187_s15 }
  0x11   : > { %s1021_s20 = scalar_lea.vmem %s1184_s2, %s687_s17 }
  0x12   : > { %v186_v10 = vld [vmem:[%s1021_s20 + $0x80] sm:$0xff]  ;;  %v187_v11 = vld [vmem:[%s1021_s20 + $0x88] sm:$0xff]  ;;  %v188_v24 = vld [vmem:[%s1021_s20 + $0x90] sm:$0xff] }
  0x13   : > { %v170_v12 = vld [vmem:[%s1021_s20] sm:$0xff]  ;;  %v828_v15 = vpack.c.bf16 %v187_v11, %v186_v10  ;;  %v171_v16 = vld [vmem:[%s1021_s20 + $0x8] sm:$0xff]  ;;  %v189_v27 = vld [vmem:[%s1021_s20 + $0x98] sm:$0xff] }
  0x14   : > { %v218_v17 = vld [vmem:[%s1021_s20 + $0x180] sm:$0xff]  ;;  %v219_v18 = vld [vmem:[%s1021_s20 + $0x188] sm:$0xff]  ;;  %v830_v20 = vpack.c.bf16 %v171_v16, %v170_v12  ;;  %v172_v28 = vld [vmem:[%s1021_s20 + $0x10] sm:$0xff]  ;;  %v832_v30 = vpack.c.bf16 %v189_v27, %v188_v24 }
  0x15   : > { %v860_v21 = vpack.c.bf16 %v219_v18, %v218_v17  ;;  %v202_v22 = vld [vmem:[%s1021_s20 + $0x100] sm:$0xff]  ;;  %v203_v23 = vld [vmem:[%s1021_s20 + $0x108] sm:$0xff]  ;;  %829 = vmatprep.subr.bf16.mxu0 %v828_v15  ;;  %v173_v29 = vld [vmem:[%s1021_s20 + $0x18] sm:$0xff] }
  0x16   : > { %v862_v26 = vpack.c.bf16 %v203_v23, %v202_v22  ;;  %831 = vmatpush3.bf16.msra.mxu0 %v830_v20  ;;  %v834_v31 = vpack.c.bf16 %v173_v29, %v172_v28  ;;  %v220_v32 = vld [vmem:[%s1021_s20 + $0x190] sm:$0xff]  ;;  %v221_v33 = vld [vmem:[%s1021_s20 + $0x198] sm:$0xff]  ;;  %v190_v37 = vld [vmem:[%s1021_s20 + $0xa0] sm:$0xff] }
  0x17   : > { %861 = vmatprep.subr.bf16.mxu1 %v860_v21  ;;  %v204_v34 = vld [vmem:[%s1021_s20 + $0x110] sm:$0xff]  ;;  %v864_v35 = vpack.c.bf16 %v221_v33, %v220_v32  ;;  %v205_v36 = vld [vmem:[%s1021_s20 + $0x118] sm:$0xff]  ;;  %v191_v38 = vld [vmem:[%s1021_s20 + $0xa8] sm:$0xff]  ;;  %833 = vmatprep.subr.bf16.mxu0 %v832_v30 }
  0x18   : > { %863 = vmatpush3.bf16.msra.mxu1 %v862_v26  ;;  %v866_v39 = vpack.c.bf16 %v205_v36, %v204_v34  ;;  %v836_v40 = vpack.c.bf16 %v191_v38, %v190_v37  ;;  %v174_v41 = vld [vmem:[%s1021_s20 + $0x20] sm:$0xff]  ;;  %v175_v42 = vld [vmem:[%s1021_s20 + $0x28] sm:$0xff]  ;;  %v192_v49 = vld [vmem:[%s1021_s20 + $0xb0] sm:$0xff] }
  0x19   : > { %v222_v43 = vld [vmem:[%s1021_s20 + $0x1a0] sm:$0xff]  ;;  %865 = vmatprep.subr.bf16.mxu1 %v864_v35  ;;  %v223_v44 = vld [vmem:[%s1021_s20 + $0x1a8] sm:$0xff]  ;;  %v838_v47 = vpack.c.bf16 %v175_v42, %v174_v41  ;;  %v193_v50 = vld [vmem:[%s1021_s20 + $0xb8] sm:$0xff] }
  0x1a   : > { %v206_v45 = vld [vmem:[%s1021_s20 + $0x120] sm:$0xff]  ;;  %v207_v46 = vld [vmem:[%s1021_s20 + $0x128] sm:$0xff]  ;;  %835 = vmatpush3.bf16.msra.mxu0 %v834_v31  ;;  %v868_v48 = vpack.c.bf16 %v223_v44, %v222_v43  ;;  %v176_v51 = vld [vmem:[%s1021_s20 + $0x30] sm:$0xff]  ;;  %v840_v53 = vpack.c.bf16 %v193_v50, %v192_v49  ;;  %v306_v50 = vsub.s32 0, %v1008_v4 }
  0x1b   : > { %837 = vmatprep.subr.bf16.mxu0 %v836_v40  ;;  %v870_v52 = vpack.c.bf16 %v207_v46, %v206_v45  ;;  %v177_v54 = vld [vmem:[%s1021_s20 + $0x38] sm:$0xff]  ;;  %v224_v55 = vld [vmem:[%s1021_s20 + $0x1b0] sm:$0xff]  ;;  %v194_v60 = vld [vmem:[%s1021_s20 + $0xc0] sm:$0xff] }
  0x1c   : > { %867 = vmatpush3.bf16.msra.mxu1 %v866_v39  ;;  %v225_v56 = vld [vmem:[%s1021_s20 + $0x1b8] sm:$0xff]  ;;  %v208_v58 = vld [vmem:[%s1021_s20 + $0x130] sm:$0xff]  ;;  %v195_v61 = vld [vmem:[%s1021_s20 + $0xc8] sm:$0xff]  ;;  %v842_v62 = vpack.c.bf16 %v177_v54, %v176_v51  ;;  %v319_v54 = vsub.s32 2, %v1008_v4 }
  0x1d   : > { %869 = vmatprep.subr.bf16.mxu1 %v868_v48  ;;  %v872_v57 = vpack.c.bf16 %v225_v56, %v224_v55  ;;  %v209_v59 = vld [vmem:[%s1021_s20 + $0x138] sm:$0xff]  ;;  %v226_v63 = vld [vmem:[%s1021_s20 + $0x1c0] sm:$0xff]  ;;  %v227_v0 = vld [vmem:[%s1021_s20 + $0x1c8] sm:$0xff]  ;;  %v844_v2 = vpack.c.bf16 %v195_v61, %v194_v60 }
  0x1e   : > { %839 = vmatpush3.bf16.msra.mxu0 %v838_v47  ;;  %v874_v1 = vpack.c.bf16 %v209_v59, %v208_v58  ;;  %v178_v3 = vld [vmem:[%s1021_s20 + $0x40] sm:$0xff]  ;;  %v179_v6 = vld [vmem:[%s1021_s20 + $0x48] sm:$0xff]  ;;  %v876_v8 = vpack.c.bf16 %v227_v0, %v226_v63  ;;  %v196_v10 = vld [vmem:[%s1021_s20 + $0xd0] sm:$0xff]  ;;  %v331_v0 = vsub.s32 5, %v1008_v4 }
  0x1f   : > { %841 = vmatprep.subr.bf16.mxu0 %v840_v53  ;;  %v210_v7 = vld [vmem:[%s1021_s20 + $0x140] sm:$0xff]  ;;  %v211_v9 = vld [vmem:[%s1021_s20 + $0x148] sm:$0xff]  ;;  %v197_v11 = vld [vmem:[%s1021_s20 + $0xd8] sm:$0xff]  ;;  %v846_v14 = vpack.c.bf16 %v179_v6, %v178_v3  ;;  %v339_v6 = vsub.s32 7, %v1008_v4 }
  0x20   : > { %871 = vmatpush3.bf16.msra.mxu1 %v870_v52  ;;  %v228_v12 = vld [vmem:[%s1021_s20 + $0x1d0] sm:$0xff]  ;;  %v229_v13 = vld [vmem:[%s1021_s20 + $0x1d8] sm:$0xff]  ;;  %v878_v15 = vpack.c.bf16 %v211_v9, %v210_v7  ;;  %v848_v16 = vpack.c.bf16 %v197_v11, %v196_v10  ;;  %v198_v23 = vld [vmem:[%s1021_s20 + $0xe0] sm:$0xff] }
  0x21   : > { %873 = vmatprep.subr.bf16.mxu1 %v872_v57  ;;  %v180_v17 = vld [vmem:[%s1021_s20 + $0x50] sm:$0xff]  ;;  %v181_v18 = vld [vmem:[%s1021_s20 + $0x58] sm:$0xff]  ;;  %v880_v21 = vpack.c.bf16 %v229_v13, %v228_v12  ;;  %v199_v24 = vld [vmem:[%s1021_s20 + $0xe8] sm:$0xff] }
  0x22   : > { %843 = vmatpush3.bf16.msra.mxu0 %v842_v62  ;;  %v212_v20 = vld [vmem:[%s1021_s20 + $0x150] sm:$0xff]  ;;  %v213_v22 = vld [vmem:[%s1021_s20 + $0x158] sm:$0xff]  ;;  %v230_v26 = vld [vmem:[%s1021_s20 + $0x1e0] sm:$0xff]  ;;  %v850_v28 = vpack.c.bf16 %v181_v18, %v180_v17  ;;  %v852_v30 = vpack.c.bf16 %v199_v24, %v198_v23  ;;  %v332_v18 = vrot.slane %v1013_v5, %v331_v0 }
  0x23   : > { %845 = vmatprep.subr.bf16.mxu0 %v844_v2  ;;  %v231_v27 = vld [vmem:[%s1021_s20 + $0x1e8] sm:$0xff]  ;;  %v882_v29 = vpack.c.bf16 %v213_v22, %v212_v20  ;;  %v182_v31 = vld [vmem:[%s1021_s20 + $0x60] sm:$0xff]  ;;  %v200_v36 = vld [vmem:[%s1021_s20 + $0xf0] sm:$0xff]  ;;  %v340_v22 = vrot.slane %v1013_v5, %v339_v6 }
  0x24   : > { %875 = vmatpush3.bf16.msra.mxu1 %v874_v1  ;;  %v183_v32 = vld [vmem:[%s1021_s20 + $0x68] sm:$0xff]  ;;  %v214_v33 = vld [vmem:[%s1021_s20 + $0x160] sm:$0xff]  ;;  %v884_v34 = vpack.c.bf16 %v231_v27, %v230_v26  ;;  %v201_v37 = vld [vmem:[%s1021_s20 + $0xf8] sm:$0xff]  ;;  %v312_v1 = vrot.slane %v1013_v5, %v306_v50 }
  0x25   : > { %877 = vmatprep.subr.bf16.mxu1 %v876_v8  ;;  %v215_v35 = vld [vmem:[%s1021_s20 + $0x168] sm:$0xff]  ;;  %v232_v38 = vld [vmem:[%s1021_s20 + $0x1f0] sm:$0xff]  ;;  %v233_v39 = vld [vmem:[%s1021_s20 + $0x1f8] sm:$0xff]  ;;  %v854_v40 = vpack.c.bf16 %v183_v32, %v182_v31  ;;  %v856_v42 = vpack.c.bf16 %v201_v37, %v200_v36  ;;  %v320_v8 = vrot.slane %v1013_v5, %v319_v54 }
  0x26   : > { %847 = vmatpush3.bf16.msra.mxu0 %v846_v14  ;;  %v886_v41 = vpack.c.bf16 %v215_v35, %v214_v33  ;;  %v184_v43 = vld [vmem:[%s1021_s20 + $0x70] sm:$0xff]  ;;  %v185_v44 = vld [vmem:[%s1021_s20 + $0x78] sm:$0xff]  ;;  %v888_v46 = vpack.c.bf16 %v233_v39, %v232_v38  ;;  %v250_v48 = vld [vmem:[%s1021_s20 + $0x280] sm:$0xff] }
  0x27   : > { %849 = vmatprep.subr.bf16.mxu0 %v848_v16  ;;  %v216_v45 = vld [vmem:[%s1021_s20 + $0x170] sm:$0xff]  ;;  %v217_v47 = vld [vmem:[%s1021_s20 + $0x178] sm:$0xff]  ;;  %v251_v49 = vld [vmem:[%s1021_s20 + $0x288] sm:$0xff]  ;;  %v858_v53 = vpack.c.bf16 %v185_v44, %v184_v43 }
  0x28   : > { %879 = vmatpush3.bf16.msra.mxu1 %v878_v15  ;;  %v282_v51 = vld [vmem:[%s1021_s20 + $0x380] sm:$0xff]  ;;  %v283_v52 = vld [vmem:[%s1021_s20 + $0x388] sm:$0xff]  ;;  %v890_v55 = vpack.c.bf16 %v217_v47, %v216_v45  ;;  %v892_v56 = vpack.c.bf16 %v251_v49, %v250_v48  ;;  %v252_v62 = vld [vmem:[%s1021_s20 + $0x290] sm:$0xff] }
  0x29   : > { %881 = vmatprep.subr.bf16.mxu1 %v880_v21  ;;  %v234_v57 = vld [vmem:[%s1021_s20 + $0x200] sm:$0xff]  ;;  %v235_v58 = vld [vmem:[%s1021_s20 + $0x208] sm:$0xff]  ;;  %v924_v60 = vpack.c.bf16 %v283_v52, %v282_v51  ;;  %v253_v63 = vld [vmem:[%s1021_s20 + $0x298] sm:$0xff] }
  0x2a   : > { %851 = vmatpush3.bf16.msra.mxu0 %v850_v28  ;;  %v266_v59 = vld [vmem:[%s1021_s20 + $0x300] sm:$0xff]  ;;  %v267_v61 = vld [vmem:[%s1021_s20 + $0x308] sm:$0xff]  ;;  %v284_v2 = vld [vmem:[%s1021_s20 + $0x390] sm:$0xff]  ;;  %v894_v7 = vpack.c.bf16 %v235_v58, %v234_v57  ;;  %v896_v10 = vpack.c.bf16 %v253_v63, %v252_v62 }
  0x2b   : > { %853 = vmatprep.subr.bf16.mxu0 %v852_v30  ;;  %v285_v3 = vld [vmem:[%s1021_s20 + $0x398] sm:$0xff]  ;;  %v926_v9 = vpack.c.bf16 %v267_v61, %v266_v59  ;;  %v236_v11 = vld [vmem:[%s1021_s20 + $0x210] sm:$0xff]  ;;  %v254_v16 = vld [vmem:[%s1021_s20 + $0x2a0] sm:$0xff] }
  0x2c   : > { %883 = vmatpush3.bf16.msra.mxu1 %v882_v29  ;;  %v237_v12 = vld [vmem:[%s1021_s20 + $0x218] sm:$0xff]  ;;  %v268_v13 = vld [vmem:[%s1021_s20 + $0x310] sm:$0xff]  ;;  %v928_v14 = vpack.c.bf16 %v285_v3, %v284_v2  ;;  %v255_v17 = vld [vmem:[%s1021_s20 + $0x2a8] sm:$0xff] }
  0x2d   : > { %885 = vmatprep.subr.bf16.mxu1 %v884_v34  ;;  %v269_v15 = vld [vmem:[%s1021_s20 + $0x318] sm:$0xff]  ;;  %v286_v20 = vld [vmem:[%s1021_s20 + $0x3a0] sm:$0xff]  ;;  %v287_v21 = vld [vmem:[%s1021_s20 + $0x3a8] sm:$0xff]  ;;  %v898_v23 = vpack.c.bf16 %v237_v12, %v236_v11  ;;  %v900_v26 = vpack.c.bf16 %v255_v17, %v254_v16 }
  0x2e   : > { %855 = vmatpush3.bf16.msra.mxu0 %v854_v40  ;;  %v930_v24 = vpack.c.bf16 %v269_v15, %v268_v13  ;;  %v238_v27 = vld [vmem:[%s1021_s20 + $0x220] sm:$0xff]  ;;  %v239_v28 = vld [vmem:[%s1021_s20 + $0x228] sm:$0xff]  ;;  %v932_v30 = vpack.c.bf16 %v287_v21, %v286_v20  ;;  %v256_v32 = vld [vmem:[%s1021_s20 + $0x2b0] sm:$0xff] }
  0x2f   : > { %857 = vmatprep.subr.bf16.mxu0 %v856_v42  ;;  %v270_v29 = vld [vmem:[%s1021_s20 + $0x320] sm:$0xff]  ;;  %v271_v31 = vld [vmem:[%s1021_s20 + $0x328] sm:$0xff]  ;;  %v257_v5 = vld [vmem:[%s1021_s20 + $0x2b8] sm:$0xff]  ;;  %v902_v35 = vpack.c.bf16 %v239_v28, %v238_v27 }
  0x30   : > { %887 = vmatpush3.bf16.msra.mxu1 %v886_v41  ;;  %v288_v33 = vld [vmem:[%s1021_s20 + $0x3b0] sm:$0xff]  ;;  %v289_v34 = vld [vmem:[%s1021_s20 + $0x3b8] sm:$0xff]  ;;  %v934_v36 = vpack.c.bf16 %v271_v31, %v270_v29  ;;  %v904_v37 = vpack.c.bf16 %v257_v5, %v256_v32  ;;  %v258_v43 = vld [vmem:[%s1021_s20 + $0x2c0] sm:$0xff] }
  0x31   : > { %889 = vmatprep.subr.bf16.mxu1 %v888_v46  ;;  %v240_v38 = vld [vmem:[%s1021_s20 + $0x230] sm:$0xff]  ;;  %v241_v39 = vld [vmem:[%s1021_s20 + $0x238] sm:$0xff]  ;;  %v936_v41 = vpack.c.bf16 %v289_v34, %v288_v33  ;;  %v259_v44 = vld [vmem:[%s1021_s20 + $0x2c8] sm:$0xff] }
  0x32   : > { %859 = vmatpush3.bf16.msra.mxu0 %v858_v53  ;;  %v272_v40 = vld [vmem:[%s1021_s20 + $0x330] sm:$0xff]  ;;  %v273_v42 = vld [vmem:[%s1021_s20 + $0x338] sm:$0xff]  ;;  %v290_v45 = vld [vmem:[%s1021_s20 + $0x3c0] sm:$0xff]  ;;  %v906_v47 = vpack.c.bf16 %v241_v39, %v240_v38  ;;  %v908_v49 = vpack.c.bf16 %v259_v44, %v258_v43 }
  0x33   : > { %893 = vmatprep.subr.bf16.mxu0 %v892_v56  ;;  %v291_v46 = vld [vmem:[%s1021_s20 + $0x3c8] sm:$0xff]  ;;  %v938_v48 = vpack.c.bf16 %v273_v42, %v272_v40  ;;  %v242_v51 = vld [vmem:[%s1021_s20 + $0x240] sm:$0xff]  ;;  %v260_v56 = vld [vmem:[%s1021_s20 + $0x2d0] sm:$0xff] }
  0x34   : > { %891 = vmatpush3.bf16.msra.mxu1 %v890_v55  ;;  %v243_v52 = vld [vmem:[%s1021_s20 + $0x248] sm:$0xff]  ;;  %v274_v53 = vld [vmem:[%s1021_s20 + $0x340] sm:$0xff]  ;;  %v940_v54 = vpack.c.bf16 %v291_v46, %v290_v45  ;;  %v261_v57 = vld [vmem:[%s1021_s20 + $0x2d8] sm:$0xff] }
  0x35   : > { %925 = vmatprep.subr.bf16.mxu1 %v924_v60  ;;  %414 = vmatmul.mubr.f32.vlgmr.msra.gmra.mrb[0].mxu0 %v312_v1  ;;  %v275_v55 = vld [vmem:[%s1021_s20 + $0x348] sm:$0xff]  ;;  %v292_v58 = vld [vmem:[%s1021_s20 + $0x3d0] sm:$0xff]  ;;  %v293_v59 = vld [vmem:[%s1021_s20 + $0x3d8] sm:$0xff]  ;;  %v910_v60 = vpack.c.bf16 %v243_v52, %v242_v51  ;;  %v912_v62 = vpack.c.bf16 %v261_v57, %v260_v56 }
  0x36   : > { %895 = vmatpush3.bf16.msra.mxu0 %v894_v7  ;;  %553 = vmatprep.mubr.f32.mxu0 %v332_v18  ;;  %v942_v61 = vpack.c.bf16 %v275_v55, %v274_v53  ;;  %v244_v63 = vld [vmem:[%s1021_s20 + $0x250] sm:$0xff]  ;;  %v245_v0 = vld [vmem:[%s1021_s20 + $0x258] sm:$0xff]  ;;  %v944_v2 = vpack.c.bf16 %v293_v59, %v292_v58  ;;  %v262_v6 = vld [vmem:[%s1021_s20 + $0x2e0] sm:$0xff] }
  0x37   : > { %484 = vmatmul.mubr.f32.vlgmr.msra.gmra.mrb[0].mxu1 %v320_v8  ;;  %897 = vmatprep.subr.bf16.mxu0 %v896_v10  ;;  %v276_v1 = vld [vmem:[%s1021_s20 + $0x350] sm:$0xff]  ;;  %v277_v3 = vld [vmem:[%s1021_s20 + $0x358] sm:$0xff]  ;;  %v263_v7 = vld [vmem:[%s1021_s20 + $0x2e8] sm:$0xff]  ;;  %v914_v10 = vpack.c.bf16 %v245_v0, %v244_v63 }
  0x38   : > { %927 = vmatpush3.bf16.msra.mxu1 %v926_v9  ;;  %623 = vmatprep.mubr.f32.mxu1 %v340_v22  ;;  %v294_v8 = vld [vmem:[%s1021_s20 + $0x3e0] sm:$0xff]  ;;  %v295_v9 = vld [vmem:[%s1021_s20 + $0x3e8] sm:$0xff]  ;;  %v946_v11 = vpack.c.bf16 %v277_v3, %v276_v1  ;;  %v916_v12 = vpack.c.bf16 %v263_v7, %v262_v6  ;;  %v264_v18 = vld [vmem:[%s1021_s20 + $0x2f0] sm:$0xff] }
  0x39   : > { %929 = vmatprep.subr.bf16.mxu1 %v928_v14  ;;  %v246_v13 = vld [vmem:[%s1021_s20 + $0x260] sm:$0xff]  ;;  %v247_v14 = vld [vmem:[%s1021_s20 + $0x268] sm:$0xff]  ;;  %v948_v16 = vpack.c.bf16 %v295_v9, %v294_v8  ;;  %v265_v20 = vld [vmem:[%s1021_s20 + $0x2f8] sm:$0xff] }
  0x3a   : > { %899 = vmatpush3.bf16.msra.mxu0 %v898_v23  ;;  %v278_v15 = vld [vmem:[%s1021_s20 + $0x360] sm:$0xff]  ;;  %v279_v17 = vld [vmem:[%s1021_s20 + $0x368] sm:$0xff]  ;;  %v296_v21 = vld [vmem:[%s1021_s20 + $0x3f0] sm:$0xff]  ;;  %v918_v23 = vpack.c.bf16 %v247_v14, %v246_v13 }
  0x3b   : > { %901 = vmatprep.subr.bf16.mxu0 %v900_v26  ;;  %v297_v22 = vld [vmem:[%s1021_s20 + $0x3f8] sm:$0xff]  ;;  %v920_v26 = vpack.c.bf16 %v265_v20, %v264_v18  ;;  %v248_v27 = vld [vmem:[%s1021_s20 + $0x270] sm:$0xff] }
  0x3c   : > { %931 = vmatpush3.bf16.msra.mxu1 %v930_v24  ;;  %v950_v24 = vpack.c.bf16 %v279_v17, %v278_v15  ;;  %v249_v28 = vld [vmem:[%s1021_s20 + $0x278] sm:$0xff]  ;;  %v952_v29 = vpack.c.bf16 %v297_v22, %v296_v21 }
  0x3d   : > { %933 = vmatprep.subr.bf16.mxu1 %v932_v30  ;;  %v280_v30 = vld [vmem:[%s1021_s20 + $0x370] sm:$0xff]  ;;  %v281_v31 = vld [vmem:[%s1021_s20 + $0x378] sm:$0xff]  ;;  %v922_v32 = vpack.c.bf16 %v249_v28, %v248_v27 }
  0x3e   : > { %903 = vmatpush3.bf16.msra.mxu0 %v902_v35  ;;  %v954_v5 = vpack.c.bf16 %v281_v31, %v280_v30 }
  0x3f   : > { %905 = vmatprep.subr.bf16.mxu0 %v904_v37 }
  0x40   : > { %935 = vmatpush3.bf16.msra.mxu1 %v934_v36 }
  0x41   : > { %937 = vmatprep.subr.bf16.mxu1 %v936_v41 }
  0x42   : > { %907 = vmatpush3.bf16.msra.mxu0 %v906_v47 }
  0x43   : > { %909 = vmatprep.subr.bf16.mxu0 %v908_v49 }
  0x44   : > { %939 = vmatpush3.bf16.msra.mxu1 %v938_v48 }
  0x45   : > { %941 = vmatprep.subr.bf16.mxu1 %v940_v54 }
  0x46   : > { %911 = vmatpush3.bf16.msra.mxu0 %v910_v60 }
  0x47   : > { %913 = vmatprep.subr.bf16.mxu0 %v912_v62 }
  0x48   : > { %943 = vmatpush3.bf16.msra.mxu1 %v942_v61 }
  0x49   : > { %945 = vmatprep.subr.bf16.mxu1 %v944_v2 }
  0x4a   : > { %915 = vmatpush3.bf16.msra.mxu0 %v914_v10 }
  0x4b   : > { %917 = vmatprep.subr.bf16.mxu0 %v916_v12 }
  0x4c   : > { %947 = vmatpush3.bf16.msra.mxu1 %v946_v11 }
  0x4d   : > { %949 = vmatprep.subr.bf16.mxu1 %v948_v16 }
  0x4e   : > { %919 = vmatpush3.bf16.msra.mxu0 %v918_v23 }
  0x4f   : > { %921 = vmatprep.subr.bf16.mxu0 %v920_v26 }
  0x50   : > { %951 = vmatpush3.bf16.msra.mxu1 %v950_v24 }
  0x51   : > { %953 = vmatprep.subr.bf16.mxu1 %v952_v29 }
  0x52   : > { %923 = vmatpush3.bf16.msra.mxu0 %v922_v32 }
  0x54   : > { %955 = vmatpush3.bf16.msra.mxu1 %v954_v5 }
  0x55   : > { %554 = vmatmul.mubr.f32.vlgmr.msra.gmra.mrb[2].mxu0 %v1034_v19 }
  0x57   : > { %624 = vmatmul.mubr.f32.vlgmr.msra.gmra.mrb[2].mxu1 %v1040_v25 }
  0x89   : > { %v302_v33 = vpop.permute.xlu0 %301 }
  0x8a   : > { %v307_v35 = vrot.slane %v302_v33, %v306_v50 }
 0x108   : > { %v720_v34 = vpop.f32.mrb[0].mxu0 }
 0x109   : > { %v721_v36 = vpop.f32.mrb[1].mxu0 }
 0x10a   : > { %v755_v37 = vpop.f32.mrb[0].mxu1  ;;  %v722_v38 = vadd.f32 %v721_v36, %v720_v34 }
 0x10b   : > { %v756_v39 = vpop.f32.mrb[1].mxu1 }
 0x10c   : > { %v757_v40 = vadd.f32 %v756_v39, %v755_v37  ;;  %v416_v41 = vadd.f32 %v722_v38, %v307_v35 }
 0x10e   : > { %v486_v42 = vadd.f32 %v757_v40, %v416_v41 }
 0x128   : > { %v790_v43 = vpop.f32.mrb[2].mxu0 }
 0x129   : > { %v791_v44 = vpop.f32.mrb[3].mxu0 }
 0x12a   : > { %v825_v45 = vpop.f32.mrb[2].mxu1  ;;  %v792_v46 = vadd.f32 %v791_v44, %v790_v43 }
 0x12b   : > { %v826_v19 = vpop.f32.mrb[3].mxu1 }
 0x12c   : > { %v827_v47 = vadd.f32 %v826_v19, %v825_v45  ;;  %v556_v25 = vadd.f32 %v792_v46, %v486_v42 }
 0x12e   : > { %v626_v4 = vadd.f32 %v827_v47, %v556_v25 }
 0x130   : > { %630 = vst.msk [vmem:[%s168_s23] sm:$0x1] %vm629_vm0, %v626_v4 }
 0x131 PF: > { %s15_s14 = sadd.s32 1, %s972_s14  }
 0x132   : > { %p12_p4 = scmp.ge.s32.totalorder %s15_s14, 4  }
 0x134   :  { %14 = sbr.rel (!%p12_p4) target bundleno = 3 (0x3), region = 62 }

</bundles_post_ra>
